<compile_context>
chip_gen: v7x
topology: tpu7x:2x2x1
jax: 0.10.0
libtpu: 0.0.40
codegen_flags: <defaults>
</compile_context>

<pallas_src>
import math

import jax
import jax.numpy as jnp
from jax.experimental import pallas as pl
from jax.experimental.pallas import tpu as pltpu


# --------------------------------------------------------------------------------------
# small helpers
# --------------------------------------------------------------------------------------
def _dim_semantics_params(sem):
    cls = getattr(pltpu, "CompilerParams", None) or getattr(pltpu, "TPUCompilerParams", None)
    return cls(dimension_semantics=sem) if cls is not None else None


def _approx_reciprocal(x):
    if hasattr(pl, "reciprocal"):
        return pl.reciprocal(x, approx=True)
    return 1.0 / x


def _choose_tile_h(h_out, wp, cin_eff, wo, cin_tap, cout, halo, budget=6 * 1024 * 1024):
    """Largest divisor of h_out whose working set (in+out double-buffered, im2col, acc)
    fits the VMEM budget (sized for v7x's 64 MiB physical / 32 MiB scoped default)."""
    best = 1
    for th in range(1, h_out + 1):
        if h_out % th:
            continue
        in_b = (th + halo) * wp * cin_eff * 4
        out_b = th * wo * cout * 4
        im2col_b = th * wo * 9 * cin_tap * 2          # bf16
        acc_b = th * wo * cout * 4
        if 2 * in_b + 2 * out_b + im2col_b + acc_b <= budget:
            best = th
    return best


def _choose_rows_tile(hw, cap=2048):
    if hw <= cap:
        return hw
    best = hw
    for t in range(8, cap + 1, 8):
        if hw % t == 0:
            best = t
    return best


# --------------------------------------------------------------------------------------
# Pallas kernels
# --------------------------------------------------------------------------------------
def _make_conv_kernel(taps, tile_h, wo, cin_tap, cout_p):
    """3x3 conv (one row tile) as a single im2col matmul + bias + PReLU.

    x_ref: (tile_h + halo, Wp, Cin_eff)  f32 (halo rows/cols included)
    w_ref: (9*Cin, Cout_p)               bf16
    b_ref, a_ref: (1, Cout_p)            f32
    o_ref: (tile_h, Wo, Cout_p)          f32
    """
    def kernel(x_ref, w_ref, b_ref, a_ref, o_ref):
        x = x_ref[...]
        cols = []
        for (dy, dx, c0) in taps:                      # static, unrolled (9 taps)
            patch = x[dy:dy + tile_h, dx:dx + wo, c0:c0 + cin_tap]
            cols.append(patch.reshape(tile_h * wo, cin_tap))
        im2col = jnp.concatenate(cols, axis=-1).astype(jnp.bfloat16)   # (THW, 9*Cin)
        acc = jnp.dot(im2col, w_ref[...], preferred_element_type=jnp.float32)
        y = acc + b_ref[...]
        a = a_ref[...]
        y = jnp.where(y >= 0.0, y, a * y)              # PReLU (alpha=1 -> identity)
        o_ref[...] = y.reshape(tile_h, wo, cout_p)
    return kernel


def _splat_normalize_kernel(acc_ref, o_ref):
    """acc_ref: (tile, C+1) = [sum(w*feat) | sum(w)];  o_ref: (tile, C)."""
    acc = acc_ref[...]
    inv = _approx_reciprocal(acc[:, -1:] + 1e-7)
    o_ref[...] = acc[:, :-1] * inv


# --------------------------------------------------------------------------------------
# conv wrapper (row-tiled, fused im2col, direct stride-2)
# --------------------------------------------------------------------------------------
def conv3x3_prelu(x, w, b, alpha, stride=1, tile_h=None):
    """x: (N,H,W,Cin), w: (3,3,Cin,Cout). Returns (N, H//stride, W//stride, Cout)."""
    assert stride in (1, 2)
    N, H, W, Cin = x.shape
    Cout = w.shape[-1]

    # pad narrow Cout so stores are not 1-lane-wide; slice back at the end.
    Cout_p = max(Cout, 8)
    if Cout_p != Cout:
        w = jnp.concatenate([w, jnp.zeros((3, 3, Cin, Cout_p - Cout), w.dtype)], axis=-1)
        b = jnp.concatenate([b, jnp.zeros((Cout_p - Cout,), b.dtype)])
        alpha = jnp.concatenate([alpha, jnp.ones((Cout_p - Cout,), alpha.dtype)])

    xp = jnp.pad(x, ((0, 0), (1, 1), (1, 1), (0, 0)))

    if stride == 1:
        xin = xp                                            # (N, H+2, W+2, Cin)
        H_out, Wo, halo = H, W, 2
        cin_tap = Cin
        taps = [(ky, kx, 0) for ky in range(3) for kx in range(3)]
    else:
        assert H % 2 == 0 and W % 2 == 0
        # space-to-depth of the padded input: phase (py,px) -> channel block p*Cin.
        phases = [xp[:, py::2, px::2, :] for py in (0, 1) for px in (0, 1)]
        xin = jnp.concatenate(phases, axis=-1)              # (N, H/2+1, W/2+1, 4*Cin)
        H_out, Wo, halo = H // 2, W // 2, 1
        cin_tap = Cin
        taps = [(ky // 2, kx // 2, ((ky % 2) * 2 + (kx % 2)) * Cin)
                for ky in range(3) for kx in range(3)]

    Wp = xin.shape[2]
    cin_eff = xin.shape[3]
    if tile_h is None:
        tile_h = _choose_tile_h(H_out, Wp, cin_eff, Wo, cin_tap, Cout_p, halo)
    assert H_out % tile_h == 0
    nt = H_out // tile_h
    tile_hp = tile_h + halo

    # overlapping row windows (halo rows duplicated).
    # TODO(synk): build the halo in-kernel (overlapping element-indexed windows) to
    # avoid this extra activation pass in HBM.
    x_win = jnp.stack([xin[:, t * tile_h: t * tile_h + tile_hp] for t in range(nt)], axis=1)

    w2 = w.reshape(9 * Cin, Cout_p).astype(jnp.bfloat16)    # tap-major, channel-minor
    b2 = b.reshape(1, Cout_p).astype(jnp.float32)
    a2 = alpha.reshape(1, Cout_p).astype(jnp.float32)

    kernel = _make_conv_kernel(taps, tile_h, Wo, cin_tap, Cout_p)
    y = pl.pallas_call(
        kernel,
        out_shape=jax.ShapeDtypeStruct((N, H_out, Wo, Cout_p), jnp.float32),
        grid=(N, nt),
        in_specs=[
            pl.BlockSpec((None, None, tile_hp, Wp, cin_eff), lambda n, t: (n, t, 0, 0, 0)),
            pl.BlockSpec((9 * Cin, Cout_p), lambda n, t: (0, 0)),
            pl.BlockSpec((1, Cout_p), lambda n, t: (0, 0)),
            pl.BlockSpec((1, Cout_p), lambda n, t: (0, 0)),
        ],
        out_specs=pl.BlockSpec((None, tile_h, Wo, Cout_p), lambda n, t: (n, t, 0, 0)),
        compiler_params=_dim_semantics_params(("parallel", "parallel")),
    )(x_win, w2, b2, a2)
    return y[..., :Cout] if Cout_p != Cout else y


# --------------------------------------------------------------------------------------
# softsplat (sparse formulation: O(HW*C), no HW x HW matrix)
# --------------------------------------------------------------------------------------
def _splat_indices_weights(flow):
    """flow: (N,H,W,2) [fx, fy] -> idx (N,4,HW) int32, weights (N,4,HW) f32."""
    N, H, W, _ = flow.shape
    HW = H * W
    ys = jnp.arange(H, dtype=jnp.float32)[None, :, None]
    xs = jnp.arange(W, dtype=jnp.float32)[None, None, :]
    outX = xs + flow[..., 0]
    outY = ys + flow[..., 1]
    x0 = jnp.floor(outX)
    y0 = jnp.floor(outY)
    x1 = x0 + 1.0
    y1 = y0 + 1.0
    corners = [
        (x0, y0, (x1 - outX) * (y1 - outY)),
        (x1, y0, (outX - x0) * (y1 - outY)),
        (x0, y1, (x1 - outX) * (outY - y0)),
        (x1, y1, (outX - x0) * (outY - y0)),
    ]
    idxs, wgts = [], []
    for cx, cy, wgt in corners:
        valid = (cx >= 0) & (cx <= W - 1) & (cy >= 0) & (cy <= H - 1)
        ii = (jnp.clip(cy, 0, H - 1).astype(jnp.int32) * W
              + jnp.clip(cx, 0, W - 1).astype(jnp.int32))
        idxs.append(ii.reshape(N, HW))
        wgts.append((wgt * valid.astype(jnp.float32)).reshape(N, HW))
    return jnp.stack(idxs, axis=1), jnp.stack(wgts, axis=1)


def softsplat(ten_in, ten_flow, ten_metric, mode):
    """Softmax splatting ('avg' / 'soft' modes), NHWC tensors."""
    N, H, W, C = ten_in.shape
    if mode == 'avg':
        feed = jnp.concatenate([ten_in, jnp.ones((N, H, W, 1), jnp.float32)], axis=-1)
    elif mode == 'soft':
        e = jnp.exp(ten_metric)
        feed = jnp.concatenate([ten_in * e, e], axis=-1)
    else:
        raise ValueError(mode)

    HW = H * W
    idx, wgt = _splat_indices_weights(ten_flow)                       # (N,4,HW)
    vals = feed.reshape(N, 1, HW, C + 1) * wgt[..., None]             # (N,4,HW,C+1)
    idx_flat = idx.reshape(N, 4 * HW)
    vals_flat = vals.reshape(N, 4 * HW, C + 1)

    # TODO(synk): the data-dependent scatter-add of forward warping has no clean
    # Pallas-TPU equivalent; it is expressed as an XLA scatter (O(HW*C)).
    acc = jax.vmap(
        lambda i, v: jnp.zeros((HW, C + 1), jnp.float32).at[i].add(v)
    )(idx_flat, vals_flat)                                            # (N, HW, C+1)

    tile = _choose_rows_tile(HW)
    nt = HW // tile
    out = pl.pallas_call(
        _splat_normalize_kernel,
        out_shape=jax.ShapeDtypeStruct((N, HW, C), jnp.float32),
        grid=(N, nt),
        in_specs=[pl.BlockSpec((None, tile, C + 1), lambda n, t: (n, t, 0))],
        out_specs=pl.BlockSpec((None, tile, C), lambda n, t: (n, t, 0)),
        compiler_params=_dim_semantics_params(("parallel", "parallel")),
    )(acc)
    return out.reshape(N, H, W, C)


# --------------------------------------------------------------------------------------
# glue ops (matching the PyTorch reference semantics)
# --------------------------------------------------------------------------------------
def _bilinear_matrix(out_size, in_size):
    """F.interpolate(mode='bilinear', align_corners=False) row matrix (out x in)."""
    scale = in_size / out_size
    o = jnp.arange(out_size, dtype=jnp.float32)
    src = jnp.maximum((o + 0.5) * scale - 0.5, 0.0)
    x0 = jnp.floor(src)
    w1 = src - x0
    w0 = 1.0 - w1
    x0i = x0.astype(jnp.int32)
    x1i = jnp.minimum(x0i + 1, in_size - 1)
    m = jnp.zeros((out_size, in_size), jnp.float32)
    rows = jnp.arange(out_size)
    m = m.at[rows, x0i].add(w0)
    m = m.at[rows, x1i].add(w1)
    return m


def resize(x, size, scale):
    """Bilinear (align_corners=False) resize; both flow components scaled by h/H,
    exactly like the PyTorch reference `resize`."""
    H, W = x.shape[1:3]
    h, w = size
    scale_ = h / H
    Rh = _bilinear_matrix(h, H)
    Rw = _bilinear_matrix(w, W)
    x_ = jnp.einsum('hH,wW,nHWc->nhwc', Rh, Rw, x)
    if scale:
        return x_ * scale_
    return x_


def binary_hole(flow):
    n, h, w, _ = flow.shape
    mask = softsplat(jnp.ones((n, h, w, 1), jnp.float32), flow, None, 'avg')
    ones = jnp.ones_like(mask)
    zeros = jnp.zeros_like(mask)
    return jnp.where(mask <= 0.5, ones, zeros)


def warp_pyramid(features, metric, flow):
    outputs, masks = [], []
    for lv in range(3):
        fea = features[lv]
        if lv != 0:
            h, w = fea.shape[1:3]
            metric = resize(metric, (h, w), scale=False)
            flow = resize(flow, (h, w), scale=True)
        outputs.append(softsplat(fea, flow, jnp.clip(-metric, -20.0, 20.0), 'soft'))
        masks.append(binary_hole(flow))
    return outputs, masks


# --------------------------------------------------------------------------------------
# sub-networks (deterministic synthetic parameters; no checkpoint loading)
# --------------------------------------------------------------------------------------
def _conv_params(key, cin, cout, prelu=True):
    kw, kb = jax.random.split(key)
    std = math.sqrt(2.0 / (9 * cin))
    w = jax.random.normal(kw, (3, 3, cin, cout), jnp.float32) * std
    b = jax.random.normal(kb, (cout,), jnp.float32) * 0.01
    a = jnp.full((cout,), 0.25 if prelu else 1.0, jnp.float32)   # alpha=1.0 => identity
    return {'w': w, 'b': b, 'a': a}


def init_params(key):
    ks = jax.random.split(key, 8)
    enc = {
        'c1a': _conv_params(ks[0], 3, 32), 'c1b': _conv_params(ks[1], 32, 32),
        'c2a': _conv_params(ks[2], 32, 64), 'c2b': _conv_params(ks[3], 64, 64),
        'c3a': _conv_params(ks[4], 64, 96), 'c3b': _conv_params(ks[5], 96, 96),
    }
    # TODO(synk): original Softmetric is a GridNet with a backwarp-based error branch
    # (definition and checkpoint not in the provided source); compact conv stand-in.
    sm = {
        'c1': _conv_params(ks[6], 35 + 35 + 2, 16),
        'c2': _conv_params(ks[7], 16, 1, prelu=False),
    }
    return {'enc': enc, 'sm': sm}


def _wba(c):
    return {'w': c['w'], 'b': c['b'], 'alpha': c['a']}


def encode(p, x):
    """3-level feature pyramid: [(N,H,W,3+32), (N,H/2,W/2,64), (N,H/4,W/4,96)]."""
    f1 = conv3x3_prelu(x, **_wba(p['c1a']), stride=1)
    f1 = conv3x3_prelu(f1, **_wba(p['c1b']), stride=1)
    f2 = conv3x3_prelu(f1, **_wba(p['c2a']), stride=2)
    f2 = conv3x3_prelu(f2, **_wba(p['c2b']), stride=1)
    f3 = conv3x3_prelu(f2, **_wba(p['c3a']), stride=2)
    f3 = conv3x3_prelu(f3, **_wba(p['c3b']), stride=1)
    return [jnp.concatenate([x, f1], axis=-1), f2, f3]


def softmetric(p, x1s, x2s, flow):
    # TODO(synk): fuse c1+c2 into a single Pallas kernel (16-wide intermediate in VMEM).
    z = jnp.concatenate([x1s[0], x2s[0], flow], axis=-1)
    z = conv3x3_prelu(z, **_wba(p['c1']), stride=1)
    z = conv3x3_prelu(z, **_wba(p['c2']), stride=1)   # alpha=1 -> no activation
    return z  # (N, H, W, 1)


# --------------------------------------------------------------------------------------
# FeaturePyramid.forward
# --------------------------------------------------------------------------------------
def feature_pyramid_forward(params, tenOne, tenTwo=None, tenFlows=None, time=0.5):
    x1s = encode(params['enc'], tenOne)
    if tenTwo is None:
        return x1s
    F12, F21 = tenFlows
    x2s = encode(params['enc'], tenTwo)
    m1t = softmetric(params['sm'], x1s, x2s, F12) * 2.0 * time
    F1t = time * F12
    m2t = softmetric(params['sm'], x2s, x1s, F21) * 2.0 * (1.0 - time)
    F2t = (1.0 - time) * F21
    Ft2 = -1.0 * softsplat(F2t, F2t, jnp.clip(-m2t, -20.0, 20.0), 'soft')
    x1s_w, bmasks = warp_pyramid(x1s, m1t, F1t)
    return list(zip(x1s_w, x2s)), bmasks, Ft2


# --------------------------------------------------------------------------------------
if __name__ == "__main__":
    key = jax.random.PRNGKey(0)
    k1, k2, k3, k4 = jax.random.split(key, 4)
    N, H, W = 2, 16, 16
    tenOne = jax.random.normal(k1, (N, H, W, 3), jnp.float32)
    tenTwo = jax.random.normal(k2, (N, H, W, 3), jnp.float32)
    F12 = jax.random.normal(k3, (N, H, W, 2), jnp.float32) * 2.0
    F21 = jax.random.normal(k4, (N, H, W, 2), jnp.float32) * 2.0

    params = init_params(jax.random.PRNGKey(42))

    # self-consistency: row tiling must not change results
    c = params['enc']['c1a']
    y_ref = conv3x3_prelu(tenOne, c['w'], c['b'], c['a'], stride=1)
    y_til = conv3x3_prelu(tenOne, c['w'], c['b'], c['a'], stride=1, tile_h=4)
    assert jnp.allclose(y_ref, y_til, atol=1e-3, rtol=1e-3)

    # self-consistency: direct stride-2 == stride-1 subsampled
    c2 = params['enc']['c2a']
    x32 = jax.random.normal(k3, (N, H, W, 32), jnp.float32)
    y_s1 = conv3x3_prelu(x32, c2['w'], c2['b'], c2['a'], stride=1)
    y_s2 = conv3x3_prelu(x32, c2['w'], c2['b'], c2['a'], stride=2)
    assert jnp.allclose(y_s1[:, ::2, ::2, :], y_s2, atol=1e-3, rtol=1e-3)

    fwd = jax.jit(feature_pyramid_forward)
    pairs, bmasks, Ft2 = fwd(params, tenOne, tenTwo, [F12, F21], 0.5)
    jax.block_until_ready((pairs, bmasks, Ft2))

    assert Ft2.shape == (N, H, W, 2)
    assert len(pairs) == 3 and len(bmasks) == 3
    assert pairs[0][0].shape == (N, H, W, 35)
    assert pairs[1][0].shape == (N, H // 2, W // 2, 64)
    assert pairs[2][0].shape == (N, H // 4, W // 4, 96)
    assert bmasks[0].shape == (N, H, W, 1)
    assert bmasks[2].shape == (N, H // 4, W // 4, 1)
    print("KERNEL_OK")
</pallas_src>

<mosaic_0001>
module attributes {stable_mosaic.version = 11 : i64} {
  func.func @kernel(%arg0: i32, %arg1: i32, %arg2: memref<1x1x18x18x3xf32, #tpu.memory_space<vmem>>, %arg3: memref<27x32xbf16, #tpu.memory_space<vmem>>, %arg4: memref<1x32xf32, #tpu.memory_space<vmem>>, %arg5: memref<1x32xf32, #tpu.memory_space<vmem>>, %arg6: memref<1x16x16x32xf32, #tpu.memory_space<vmem>>) attributes {dimension_semantics = [#tpu.dimension_semantics<parallel>, #tpu.dimension_semantics<parallel>], iteration_bounds = array<i64: 2, 1>, scalar_prefetch = 0 : i64, scratch_operands = 0 : i64, tpu.core_type = #tpu.core_type<tc>, window_params = [{transform_indices = @transform_0, window_bounds = array<i64: 1, 1, 18, 18, 3>}, {pipeline_mode = #tpu.pipeline_mode<synchronous>, transform_indices = @transform_1, window_bounds = array<i64: 27, 32>}, {pipeline_mode = #tpu.pipeline_mode<synchronous>, transform_indices = @transform_2, window_bounds = array<i64: 1, 32>}, {pipeline_mode = #tpu.pipeline_mode<synchronous>, transform_indices = @transform_3, window_bounds = array<i64: 1, 32>}, {transform_indices = @transform_4, window_bounds = array<i64: 1, 16, 16, 32>}]} {
    %c0 = arith.constant 0 : index
    %c0_0 = arith.constant 0 : index
    %c0_1 = arith.constant 0 : index
    %c0_2 = arith.constant 0 : index
    %c0_3 = arith.constant 0 : index
    %0 = vector.load %arg2[%c0, %c0_0, %c0_1, %c0_2, %c0_3] : memref<1x1x18x18x3xf32, #tpu.memory_space<vmem>>, vector<1x1x18x18x3xf32>
    %1 = vector.shape_cast %0 : vector<1x1x18x18x3xf32> to vector<18x18x3xf32>
    %2 = vector.extract_strided_slice %1 {offsets = [0, 0, 0], sizes = [16, 16, 3], strides = [1, 1, 1]} : vector<18x18x3xf32> to vector<16x16x3xf32>
    %3 = vector.shape_cast %2 : vector<16x16x3xf32> to vector<256x3xf32>
    %4 = vector.extract_strided_slice %1 {offsets = [0, 1, 0], sizes = [16, 16, 3], strides = [1, 1, 1]} : vector<18x18x3xf32> to vector<16x16x3xf32>
    %5 = vector.shape_cast %4 : vector<16x16x3xf32> to vector<256x3xf32>
    %6 = vector.extract_strided_slice %1 {offsets = [0, 2, 0], sizes = [16, 16, 3], strides = [1, 1, 1]} : vector<18x18x3xf32> to vector<16x16x3xf32>
    %7 = vector.shape_cast %6 : vector<16x16x3xf32> to vector<256x3xf32>
    %8 = vector.extract_strided_slice %1 {offsets = [1, 0, 0], sizes = [16, 16, 3], strides = [1, 1, 1]} : vector<18x18x3xf32> to vector<16x16x3xf32>
    %9 = vector.shape_cast %8 : vector<16x16x3xf32> to vector<256x3xf32>
    %10 = vector.extract_strided_slice %1 {offsets = [1, 1, 0], sizes = [16, 16, 3], strides = [1, 1, 1]} : vector<18x18x3xf32> to vector<16x16x3xf32>
    %11 = vector.shape_cast %10 : vector<16x16x3xf32> to vector<256x3xf32>
    %12 = vector.extract_strided_slice %1 {offsets = [1, 2, 0], sizes = [16, 16, 3], strides = [1, 1, 1]} : vector<18x18x3xf32> to vector<16x16x3xf32>
    %13 = vector.shape_cast %12 : vector<16x16x3xf32> to vector<256x3xf32>
    %14 = vector.extract_strided_slice %1 {offsets = [2, 0, 0], sizes = [16, 16, 3], strides = [1, 1, 1]} : vector<18x18x3xf32> to vector<16x16x3xf32>
    %15 = vector.shape_cast %14 : vector<16x16x3xf32> to vector<256x3xf32>
    %16 = vector.extract_strided_slice %1 {offsets = [2, 1, 0], sizes = [16, 16, 3], strides = [1, 1, 1]} : vector<18x18x3xf32> to vector<16x16x3xf32>
    %17 = vector.shape_cast %16 : vector<16x16x3xf32> to vector<256x3xf32>
    %18 = vector.extract_strided_slice %1 {offsets = [2, 2, 0], sizes = [16, 16, 3], strides = [1, 1, 1]} : vector<18x18x3xf32> to vector<16x16x3xf32>
    %19 = vector.shape_cast %18 : vector<16x16x3xf32> to vector<256x3xf32>
    %20 = tpu.concatenate %3, %5, %7, %9, %11, %13, %15, %17, %19 in 1 : vector<256x3xf32>, vector<256x3xf32>, vector<256x3xf32>, vector<256x3xf32>, vector<256x3xf32>, vector<256x3xf32>, vector<256x3xf32>, vector<256x3xf32>, vector<256x3xf32> -> vector<256x27xf32>
    %21 = arith.truncf %20 : vector<256x27xf32> to vector<256x27xbf16>
    %c0_4 = arith.constant 0 : index
    %c0_5 = arith.constant 0 : index
    %22 = vector.load %arg3[%c0_4, %c0_5] : memref<27x32xbf16, #tpu.memory_space<vmem>>, vector<27x32xbf16>
    %cst = arith.constant dense<0.000000e+00> : vector<256x32xf32>
    %23 = tpu.matmul %21, %22, %cst {dimension_numbers = #tpu.dot_dimension_numbers<[1], [0], [0], [1], [0, 0, 1, 1], [], []>} : vector<256x27xbf16>, vector<27x32xbf16>, vector<256x32xf32> -> vector<256x32xf32>
    %c0_6 = arith.constant 0 : index
    %c0_7 = arith.constant 0 : index
    %24 = vector.load %arg4[%c0_6, %c0_7] : memref<1x32xf32, #tpu.memory_space<vmem>>, vector<1x32xf32>
    %25 = vector.broadcast %24 : vector<1x32xf32> to vector<256x32xf32>
    %26 = arith.addf %23, %25 : vector<256x32xf32>
    %c0_8 = arith.constant 0 : index
    %c0_9 = arith.constant 0 : index
    %27 = vector.load %arg5[%c0_8, %c0_9] : memref<1x32xf32, #tpu.memory_space<vmem>>, vector<1x32xf32>
    %cst_10 = arith.constant 0.000000e+00 : f32
    %28 = vector.broadcast %cst_10 : f32 to vector<256x32xf32>
    %29 = arith.cmpf oge, %26, %28 : vector<256x32xf32>
    %30 = vector.broadcast %27 : vector<1x32xf32> to vector<256x32xf32>
    %31 = arith.mulf %30, %26 : vector<256x32xf32>
    %32 = arith.select %29, %26, %31 : vector<256x32xi1>, vector<256x32xf32>
    %33 = vector.shape_cast %32 : vector<256x32xf32> to vector<16x16x32xf32>
    %c0_11 = arith.constant 0 : index
    %c0_12 = arith.constant 0 : index
    %c0_13 = arith.constant 0 : index
    %c0_14 = arith.constant 0 : index
    %34 = vector.load %arg6[%c0_11, %c0_12, %c0_13, %c0_14] : memref<1x16x16x32xf32, #tpu.memory_space<vmem>>, vector<1x16x16x32xf32>
    %35 = vector.shape_cast %34 : vector<1x16x16x32xf32> to vector<16x16x32xf32>
    %36 = vector.shape_cast %33 : vector<16x16x32xf32> to vector<1x16x16x32xf32>
    tpu.vector_store %arg6[%c0_11, %c0_12, %c0_13, %c0_14], %36 {strides = array<i32>} : memref<1x16x16x32xf32, #tpu.memory_space<vmem>>, vector<1x16x16x32xf32>,
    return
  }
  func.func @transform_0(%arg0: i32, %arg1: i32) -> (i32, i32, i32, i32, i32) {
    %c0_i32 = arith.constant 0 : i32
    %c0_i32_0 = arith.constant 0 : i32
    %c0_i32_1 = arith.constant 0 : i32
    %c0_i32_2 = arith.constant 0 : i32
    return %arg0, %arg1, %c0_i32, %c0_i32_0, %c0_i32_1 : i32, i32, i32, i32, i32
  }
  func.func @transform_1(%arg0: i32, %arg1: i32) -> (i32, i32) {
    %c0_i32 = arith.constant 0 : i32
    %c0_i32_0 = arith.constant 0 : i32
    %c0_i32_1 = arith.constant 0 : i32
    return %c0_i32, %c0_i32_0 : i32, i32
  }
  func.func @transform_2(%arg0: i32, %arg1: i32) -> (i32, i32) {
    %c0_i32 = arith.constant 0 : i32
    %c0_i32_0 = arith.constant 0 : i32
    %c0_i32_1 = arith.constant 0 : i32
    return %c0_i32, %c0_i32_0 : i32, i32
  }
  func.func @transform_3(%arg0: i32, %arg1: i32) -> (i32, i32) {
    %c0_i32 = arith.constant 0 : i32
    %c0_i32_0 = arith.constant 0 : i32
    %c0_i32_1 = arith.constant 0 : i32
    return %c0_i32, %c0_i32_0 : i32, i32
  }
  func.func @transform_4(%arg0: i32, %arg1: i32) -> (i32, i32, i32, i32) {
    %c0_i32 = arith.constant 0 : i32
    %c0_i32_0 = arith.constant 0 : i32
    %c0_i32_1 = arith.constant 0 : i32
    return %arg0, %arg1, %c0_i32, %c0_i32_0 : i32, i32, i32, i32
  }
}

</mosaic_0001>

<bundles_post_ra>
// kernel: tpu_custom_call.1
= control target key start
LH: loop header
LB: loop body
LE: loop exit
PB: predicated region body
PF: predicated region fallthrough
CT: control target
= control target key end

     0   :  { %9 = vsyncpa [#allocation3], 0  ;;  %s4611_s0 = inlined_call_operand.vmem [shape: f32[2,1,18,18,3], index: 0, kind: input, shape index: {}]   ;;  %s4612_s1 = inlined_call_operand.vmem [shape: bf16[27,32], index: 1, kind: input, shape index: {}]   ;;  %s4613_s2 = inlined_call_operand.vmem [shape: f32[1,32], index: 2, kind: input, shape index: {}]   ;;  %s4614_s3 = inlined_call_operand.vmem [shape: f32[1,32], index: 3, kind: input, shape index: {}]   ;;  %s4615_s4 = inlined_call_operand.hbm [shape: f32[2,16,16,32], index: 4, kind: output, shape index: {}]  }
   0x1   :  { %11 = vsyncpa [#allocation3 + $0x1], 0  ;;  %s2972_s15 = smov 0   ;;  %s2974_s16 = smov 0  }
   0x2   :  { %s2976_s17 = smov 0   ;;  %s2978_s18 = smov 0  }
   0x3   :  { %s2980_s19 = smov 0   ;;  %s2982_s20 = smov 0  }
   0x4 LB: > { %s2037_s21 = sadd.s32 4294967295, %s2933_s20   ;;  %s2038_s22 = sadd.s32 4294967294, %s2933_s20   ;;  %s2933_s20 = sphi %s2982_s20, %s17_s20   ;;  %s2929_s19 = sphi %s2980_s19, %s4753_s19   ;;  %s2925_s18 = sphi %s2978_s18, %s4752_s18   ;;  %s2921_s17 = sphi %s2976_s17, %s4751_s17   ;;  %s2917_s16 = sphi %s2974_s16, %s4750_s16   ;;  %s2913_s15 = sphi %s2972_s15, %s4749_s15  }
   0x5   : > { %s29_s23 = sadd.s32 1, %s2929_s19  ;;  %s129_s24 = sadd.s32 1, %s2921_s17 }
   0x6   : > { %p31_p0 = scmp.ge.s32.totalorder %s29_s23, 2  ;;  %p139_p1 = scmp.ne.s32.totalorder %s2921_s17, %s2917_s16 }
   0x7   : > { %p140_p2 = scmp.eq.s32.totalorder %s2037_s21, 1  ;;  %p145_p3 = scmp.ne.s32.totalorder %s2917_s16, %s2913_s15 }
   0x8   : > { %s4755_s23 = smov (%p31_p0, %s29_s23), 0  ;;  %p146_p5 = scmp.eq.s32.totalorder %s2038_s22, 1 }
   0x9   : > { %p3012_p4 = por %p140_p2, %p139_p1  ;;  %s124_s26 = ssub.s32 %s2929_s19, %s4755_s23 }
   0xa   : > { %p2041_p6 = scmp.ge.s32.totalorder %s2933_s20, 1  ;;  %p127_p7 = scmp.eq.s32.totalorder %s124_s26, 0 }
   0xb   : > { %p3019_p8 = por %p146_p5, %p145_p3  ;;  %p185_p9 = scmp.lt.s32.totalorder %s2933_s20, 3 }
   0xc   : > { %s3025_s28 = scalar_select %p127_p7, %s2921_s17, %s129_s24  }
   0xd   : > { %p186_p10 = pnand %p2041_p6, %p185_p9 }
   0xf   : > { %189 = sbr.rel (%p186_p10) target bundleno = 646 (0x286), region = 36 }
  0x16   : > { %p215_p11 = scmp.lt.s32.totalorder %s2925_s18, 1  ;;  %vm328_vm0 = vcmask 1046528   ;;  %s2935_s8 = smov 3   ;;  %vm409_vm1 = vcmask 1045504   ;;  %vm1635_vm2 = vcmask 1044480   ;;  %vm1284_vm3 = vcmask 23552  }
  0x17   : > { %s2936_s9 = smov 6   ;;  %s2937_s10 = smov 9   ;;  %vm1317_vm4 = vcmask 48128   ;;  %vm1350_vm5 = vcmask 72704   ;;  %vm1383_vm6 = vcmask 97280   ;;  %vm1416_vm7 = vcmask 121856  }
  0x18   : > { %s216_s29 = scalar_select %p215_p11, %s2925_s18, 1  ;;  %vm1449_vm8 = vcmask 146432   ;;  %vm1482_vm9 = vcmask 171008   ;;  %vm1515_vm10 = vcmask 195584   ;;  %vm1586_vm11 = vcmask 220160  }
  0x19   : > { %s2938_s11 = smov 12   ;;  %s2939_s12 = smov 15   ;;  %vm1905_vm13 = vcmask 261120  }
  0x1a   : > { %s2128_s30 = smul.u32 432, %s216_s29  ;;  %s2940_s13 = smov 18  }
  0x1b   : > { %s2941_s22 = smov 21   ;;  %s2943_s29 = smov 24  }
  0x1c   : > { %s3032_s7 = scalar_lea.vmem %s4611_s0, %s2128_s30  ;;  %s212_s30 = sand.u32 1, %s2917_s16  }
  0x1d   : > { %v3035_v0 = vld [vmem:[%s3032_s7 + $0x30] sm:$0xff]  ;;  %v3038_v1 = vld [vmem:[%s3032_s7 + $0x38] sm:$0xff]  ;;  %v3041_v2 = vld [vmem:[%s3032_s7 + $0x40] sm:$0x3]  ;;  %s4565_s21 = scalar_lea.sflag [#allocation3], %s212_s30  ;;  %s2944_s24 = smov [#allocation2]  }
  0x1e   : > { %v339_v3 = vrot.slane %v3035_v0, 1  ;;  %v340_v4 = vrot.slane %v3038_v1, 1  ;;  %v342_v5 = vrot.slane %v3041_v2, 1  ;;  %v3047_v6 = vld [vmem:[%s3032_s7] sm:$0xff]  ;;  %v3050_v7 = vld [vmem:[%s3032_s7 + $0x8] sm:$0xff]  ;;  %v3061_v12 = vld [vmem:[%s3032_s7 + $0x50] sm:$0xff] }
  0x1f   : > { %v3053_v8 = vld [vmem:[%s3032_s7 + $0x10] sm:$0x3]  ;;  %v329_v9 = vrot.slane %v3047_v6, 1  ;;  %v330_v10 = vrot.slane %v3050_v7, 1  ;;  %v3058_v11 = vld [vmem:[%s3032_s7 + $0x48] sm:$0xff]  ;;  %v3070_v17 = vld [vmem:[%s3032_s7 + $0x18] sm:$0xff] }
  0x20   : > { %v341_v13 = vsel %vm328_vm0, %v339_v3, %v340_v4  ;;  %v343_v14 = vsel %vm328_vm0, %v340_v4, %v342_v5  ;;  %v332_v15 = vrot.slane %v3053_v8, 1  ;;  %v3067_v16 = vld [vmem:[%s3032_s7 + $0x58] sm:$0x3]  ;;  %v3073_v18 = vld [vmem:[%s3032_s7 + $0x20] sm:$0xff]  ;;  %v344_v21 = vrot.slane %v3058_v11, 1  ;;  %v3107_v36 = vld [vmem:[%s3032_s7 + $0x68] sm:$0xff] }
  0x21   : > { %v3075_v19 = vpack.i.bf16 %v343_v14, %v341_v13  ;;  %v331_v20 = vsel %vm328_vm0, %v329_v9, %v330_v10  ;;  %v345_v22 = vrot.slane %v3061_v12, 1  ;;  %v3081_v23 = vld [vmem:[%s3032_s7 + $0x28] sm:$0x3]  ;;  %v3084_v24 = vld [vmem:[%s3032_s7 + $0x78] sm:$0xff]  ;;  %v3087_v25 = vld [vmem:[%s3032_s7 + $0x80] sm:$0xff]  ;;  %v347_v27 = vrot.slane %v3067_v16, 1 }
  0x22   : > { %v333_v26 = vsel %vm328_vm0, %v330_v10, %v332_v15  ;;  %v334_v28 = vrot.slane %v3070_v17, 1  ;;  %v335_v29 = vrot.slane %v3073_v18, 1  ;;  %v3094_v30 = vld [vmem:[%s3032_s7 + $0x88] sm:$0x3]  ;;  %v3097_v31 = vld [vmem:[%s3032_s7 + $0x60] sm:$0xff]  ;;  %v337_v34 = vrot.slane %v3081_v23, 1 }
  0x23   : > { %4659 = vst [vmem:[#allocation5_spill] sm:$0xff] %v3075_v19  ;;  %2206 = vrot.lane.b32.xlu1 %v3075_v19, %s2935_s8  ;;  %v2195_v32 = vpack.i.bf16 %v333_v26, %v331_v20  ;;  %v3102_v33 = vsel %vm328_vm0, %v344_v21, %v345_v22  ;;  %v354_v35 = vrot.slane %v3084_v24, 1  ;;  %v3110_v37 = vld [vmem:[%s3032_s7 + $0x70] sm:$0x3]  ;;  %v3113_v38 = vsel %vm328_vm0, %v345_v22, %v347_v27  ;;  %v3119_v42 = vld [vmem:[%s3032_s7 + $0xa8] sm:$0xff]  ;;  %v3139_v50 = vld [vmem:[%s3032_s7 + $0x98] sm:$0xff] }
  0x24   : > { %4660 = vst [vmem:[#allocation6_spill] sm:$0xff] %v3102_v33  ;;  %4661 = vst [vmem:[#allocation7_spill] sm:$0xff] %v3113_v38  ;;  %v336_v39 = vsel %vm328_vm0, %v334_v28, %v335_v29  ;;  %v355_v40 = vrot.slane %v3087_v25, 1  ;;  %v357_v41 = vrot.slane %v3094_v30, 1  ;;  %v3122_v43 = vld [vmem:[%s3032_s7 + $0xb0] sm:$0xff]  ;;  %v3127_v44 = vpack.i.bf16 %v3113_v38, %v3102_v33  ;;  %v3150_v56 = vld [vmem:[%s3032_s7 + $0xd8] sm:$0xff] }
  0x25   : > { %2196 = vrot.lane.b32.xlu0 %v2195_v32, %s2935_s8  ;;  %v338_v45 = vsel %vm328_vm0, %v335_v29, %v337_v34  ;;  %v349_v46 = vrot.slane %v3097_v31, 1  ;;  %v350_v47 = vrot.slane %v3107_v36, 1  ;;  %v3133_v48 = vld [vmem:[%s3032_s7 + $0xb8] sm:$0x3]  ;;  %v3136_v49 = vld [vmem:[%s3032_s7 + $0x90] sm:$0xff]  ;;  %v352_v54 = vrot.slane %v3110_v37, 1 }
  0x26   : > { %4662 = vst [vmem:[#allocation8_spill] sm:$0xff] %v3127_v44  ;;  %v3141_v51 = vpack.i.bf16 %v338_v45, %v336_v39  ;;  %v356_v52 = vsel %vm328_vm0, %v354_v35, %v355_v40  ;;  %v358_v53 = vsel %vm328_vm0, %v355_v40, %v357_v41  ;;  %v3147_v55 = vld [vmem:[%s3032_s7 + $0xa0] sm:$0x3]  ;;  %v364_v59 = vrot.slane %v3119_v42, 1  ;;  %v3163_v62 = vld [vmem:[%s3032_s7 + $0xe8] sm:$0x3] }
  0x27   : > { %2211 = vrot.lane.b32.xlu1 %v3127_v44, %s2935_s8  ;;  %v3154_v57 = vpack.i.bf16 %v358_v53, %v356_v52  ;;  %v351_v58 = vsel %vm328_vm0, %v349_v46, %v350_v47  ;;  %v365_v60 = vrot.slane %v3122_v43, 1  ;;  %v3160_v61 = vld [vmem:[%s3032_s7 + $0xe0] sm:$0xff]  ;;  %v353_v63 = vsel %vm328_vm0, %v350_v47, %v352_v54  ;;  %v3173_v10 = vld [vmem:[%s3032_s7 + $0xc8] sm:$0xff]  ;;  %v3183_v21 = vld [vmem:[%s3032_s7 + $0xd0] sm:$0x3]  ;;  %s2859_s26 = sshll.u32 %s2944_s24, 4  ;;  %s2860_s26 = int_to_ptr.vmem [resolvable:$false] %s2859_s26 }
  0x28   : > { %4663 = vst [vmem:[#allocation9_spill] sm:$0xff] %v3141_v51  ;;  %v367_v3 = vrot.slane %v3133_v48, 1  ;;  %v359_v4 = vrot.slane %v3136_v49, 1  ;;  %v360_v5 = vrot.slane %v3139_v50, 1  ;;  %v3170_v9 = vld [vmem:[%s3032_s7 + $0xc0] sm:$0xff]  ;;  %v3177_v13 = vpack.i.bf16 %v353_v63, %v351_v58  ;;  %v3190_v29 = vld [vmem:[%s3032_s7 + $0x108] sm:$0xff] }
  0x29   : > { %4664 = vst [vmem:[#allocation10_spill] sm:$0xff] %v3154_v57  ;;  %2201 = vrot.lane.b32.xlu0 %v3141_v51, %s2935_s8  ;;  %v366_v14 = vsel %vm328_vm0, %v364_v59, %v365_v60  ;;  %v362_v15 = vrot.slane %v3147_v55, 1  ;;  %v374_v20 = vrot.slane %v3150_v56, 1  ;;  %v375_v27 = vrot.slane %v3160_v61, 1  ;;  %v3193_v32 = vld [vmem:[%s3032_s7 + $0x110] sm:$0xff]  ;;  %v3209_v46 = vld [vmem:[%s3032_s7 + $0xf8] sm:$0xff] }
  0x2a   : > { %4665 = vst [vmem:[#allocation11_spill] sm:$0xff] %v3177_v13  ;;  %v368_v22 = vsel %vm328_vm0, %v365_v60, %v367_v3  ;;  %v361_v26 = vsel %vm328_vm0, %v359_v4, %v360_v5  ;;  %v377_v28 = vrot.slane %v3163_v62, 1  ;;  %v369_v39 = vrot.slane %v3170_v9, 1  ;;  %v3203_v41 = vld [vmem:[%s3032_s7 + $0x118] sm:$0x3]  ;;  %v3206_v45 = vld [vmem:[%s3032_s7 + $0xf0] sm:$0xff] }
  0x2b   : > { %2221 = vrot.lane.b32.xlu1 %v3154_v57, %s2935_s8  ;;  %v3197_v34 = vpack.i.bf16 %v368_v22, %v366_v14  ;;  %v363_v35 = vsel %vm328_vm0, %v360_v5, %v362_v15  ;;  %v370_v40 = vrot.slane %v3173_v10, 1  ;;  %v3212_v47 = vsel %vm328_vm0, %v374_v20, %v375_v27  ;;  %v3219_v54 = vld [vmem:[%s3032_s7 + $0x100] sm:$0x3]  ;;  %v3229_v3 = vld [vmem:[%s3032_s7 + $0x138] sm:$0xff]  ;;  %v3235_v5 = vld [vmem:[%s3032_s7 + $0x148] sm:$0x3] }
  0x2c   : > { %4667 = vst [vmem:[#allocation13_spill] sm:$0xff] %v3212_v47  ;;  %v3215_v52 = vsel %vm328_vm0, %v375_v27, %v377_v28  ;;  %v372_v53 = vrot.slane %v3183_v21, 1  ;;  %v3223_v58 = vpack.i.bf16 %v363_v35, %v361_v26  ;;  %v384_v60 = vrot.slane %v3190_v29, 1  ;;  %v3232_v4 = vld [vmem:[%s3032_s7 + $0x140] sm:$0xff]  ;;  %v3245_v27 = vld [vmem:[%s3032_s7 + $0x128] sm:$0xff]  ;;  %v3291_v38 = vld [vmem:[%s3032_s7 + $0x150] sm:$0xff] }
  0x2d   : > { %4666 = vst [vmem:[#allocation12_spill] sm:$0xff] %v3197_v34  ;;  %4668 = vst [vmem:[#allocation14_spill] sm:$0xff] %v3215_v52  ;;  %2216 = vrot.lane.b32.xlu0 %v3177_v13, %s2935_s8  ;;  %v371_v59 = vsel %vm328_vm0, %v369_v39, %v370_v40  ;;  %v385_v63 = vrot.slane %v3193_v32, 1  ;;  %v387_v15 = vrot.slane %v3203_v41, 1  ;;  %v379_v20 = vrot.slane %v3206_v45, 1  ;;  %v3242_v26 = vld [vmem:[%s3032_s7 + $0x120] sm:$0xff] }
  0x2e   : > { %4669 = vst [vmem:[#allocation15_spill] sm:$0xff] %v3223_v58  ;;  %v373_v14 = vsel %vm328_vm0, %v370_v40, %v372_v53  ;;  %v380_v22 = vrot.slane %v3209_v46, 1  ;;  %4670 = vst [vmem:[#allocation16_spill] sm:$0xff] %v3245_v27  ;;  %v3251_v28 = vpack.i.bf16 %v3215_v52, %v3212_v47  ;;  %v382_v39 = vrot.slane %v3219_v54, 1  ;;  %v3256_v40 = vld [vmem:[%s3032_s7 + $0x130] sm:$0x3] }
  0x2f   : > { %2231 = vrot.lane.b32.xlu1 %v3197_v34, %s2935_s8  ;;  %v386_v35 = vsel %vm328_vm0, %v384_v60, %v385_v63  ;;  %4672 = vst [vmem:[#allocation18_spill] sm:$0xff] %v3256_v40  ;;  %v388_v53 = vsel %vm328_vm0, %v385_v63, %v387_v15  ;;  %v394_v57 = vrot.slane %v3229_v3, 1  ;;  %v395_v13 = vrot.slane %v3232_v4, 1  ;;  %v3263_v34 = vld [vmem:[%s3032_s7 + $0x168] sm:$0xff]  ;;  %v3266_v47 = vld [vmem:[%s3032_s7 + $0x170] sm:$0xff] }
  0x30   : > { %4671 = vst [vmem:[#allocation17_spill] sm:$0xff] %v3251_v28  ;;  %v397_v44 = vrot.slane %v3235_v5, 1  ;;  %4673 = vst [vmem:[#allocation19_spill] sm:$0xff] %v3263_v34  ;;  %v3270_v60 = vpack.i.bf16 %v373_v14, %v371_v59  ;;  %v389_v63 = vrot.slane %v3242_v26, 1  ;;  %v390_v15 = vrot.slane %v3245_v27, 1  ;;  %v3294_v27 = vld [vmem:[%s3032_s7 + $0x158] sm:$0xff] }
  0x31   : > { %4674 = vst [vmem:[#allocation20_spill] sm:$0xff] %v3266_v47  ;;  %2226 = vrot.lane.b32.xlu0 %v3223_v58, %s2935_s8  ;;  %v3275_v33 = vld [vmem:[%s3032_s7 + $0x178] sm:$0x3]  ;;  %v3278_v51 = vsel %vm328_vm0, %v379_v20, %v380_v22  ;;  %v3281_v52 = vsel %vm328_vm0, %v380_v22, %v382_v39  ;;  %v392_v19 = vrot.slane %v3256_v40, 1  ;;  %v3286_v58 = vpack.i.bf16 %v388_v53, %v386_v35  ;;  %v3297_v20 = vld [vmem:[%s3032_s7 + $0x160] sm:$0x3] }
  0x32   : > { %4675 = vst [vmem:[#allocation21_spill] sm:$0xff] %v3270_v60  ;;  %4676 = vst [vmem:[#allocation22_spill] sm:$0xff] %v3278_v51  ;;  %v404_v59 = vrot.slane %v3263_v34, 1  ;;  %v405_v14 = vrot.slane %v3266_v47, 1  ;;  %v396_v22 = vsel %vm328_vm0, %v394_v57, %v395_v13  ;;  %v398_v39 = vsel %vm328_vm0, %v395_v13, %v397_v44 }
  0x33   : > { %2241 = vrot.lane.b32.xlu1 %v3251_v28, %s2935_s8  ;;  %4677 = vst [vmem:[#allocation23_spill] sm:$0xff] %v3286_v58  ;;  %v407_v40 = vrot.slane %v3275_v33, 1  ;;  %v3306_v35 = vpack.i.bf16 %v3281_v52, %v3278_v51  ;;  %v391_v53 = vsel %vm328_vm0, %v389_v63, %v390_v15  ;;  %v393_v28 = vsel %vm328_vm0, %v390_v15, %v392_v19 }
  0x34   : > { %v399_v47 = vrot.slane %v3291_v38, 1  ;;  %v400_v34 = vrot.slane %v3294_v27, 1  ;;  %v402_v57 = vrot.slane %v3297_v20, 1  ;;  %v3315_v44 = vpack.i.bf16 %v398_v39, %v396_v22 }
  0x35   : > { %2236 = vrot.lane.b32.xlu0 %v3270_v60, %s2935_s8  ;;  %v406_v13 = vsel %vm328_vm0, %v404_v59, %v405_v14  ;;  %v408_v60 = vsel %vm328_vm0, %v405_v14, %v407_v40  ;;  %v415_v51 = vrot.slane %v3070_v17, 2  ;;  %v416_v63 = vrot.slane %v3073_v18, 2 }
  0x36   : > { %4678 = vst [vmem:[#allocation24_spill] sm:$0xff] %v3315_v44  ;;  %v418_v19 = vrot.slane %v3081_v23, 2  ;;  %v3324_v15 = vpack.i.bf16 %v393_v28, %v391_v53  ;;  %v411_v22 = vrot.slane %v3050_v7, 2  ;;  %v413_v59 = vrot.slane %v3053_v8, 2 }
  0x37   : > { %2251 = vrot.lane.b32.xlu1 %v3286_v58, %s2935_s8  ;;  %v410_v58 = vrot.slane %v3047_v6, 2  ;;  %v401_v40 = vsel %vm328_vm0, %v399_v47, %v400_v34  ;;  %v403_v14 = vsel %vm328_vm0, %v400_v34, %v402_v57  ;;  %v3333_v23 = vpack.i.bf16 %v408_v60, %v406_v13 }
  0x38   : > { %v425_v39 = vrot.slane %v3058_v11, 2  ;;  %v426_v28 = vrot.slane %v3061_v12, 2  ;;  %v428_v53 = vrot.slane %v3067_v16, 2  ;;  %v423_v6 = vrot.slane %v3041_v2, 2 }
  0x39   : > { %2246 = vrot.lane.b32.xlu0 %v3306_v35, %s2935_s8  ;;  %4679 = vst [vmem:[#allocation25_spill] sm:$0xff] %v3333_v23  ;;  %v417_v7 = vsel %vm409_vm1, %v415_v51, %v416_v63  ;;  %v419_v8 = vsel %vm409_vm1, %v416_v63, %v418_v19  ;;  %v3343_v34 = vpack.i.bf16 %v403_v14, %v401_v40  ;;  %v420_v60 = vrot.slane %v3035_v0, 2 }
  0x3a   : > { %v412_v47 = vsel %vm409_vm1, %v410_v58, %v411_v22  ;;  %v421_v57 = vrot.slane %v3038_v1, 2  ;;  %v414_v13 = vsel %vm409_vm1, %v411_v22, %v413_v59  ;;  %v435_v16 = vrot.slane %v3084_v24, 2 }
  0x3b   : > { %2261 = vrot.lane.b32.xlu1 %v3315_v44, %s2935_s8  ;;  %v436_v2 = vrot.slane %v3087_v25, 2  ;;  %v438_v51 = vrot.slane %v3094_v30, 2  ;;  %v3354_v63 = vpack.i.bf16 %v419_v8, %v417_v7  ;;  %v427_v19 = vsel %vm409_vm1, %v425_v39, %v426_v28 }
  0x3c   : > { %v429_v58 = vsel %vm409_vm1, %v426_v28, %v428_v53  ;;  %v430_v40 = vrot.slane %v3097_v31, 2  ;;  %v431_v14 = vrot.slane %v3107_v36, 2  ;;  %v433_v22 = vrot.slane %v3110_v37, 2 }
  0x3d   : > { %2256 = vrot.lane.b32.xlu0 %v3324_v15, %s2935_s8  ;;  %v2275_v59 = vpack.i.bf16 %v414_v13, %v412_v47  ;;  %v422_v30 = vsel %vm409_vm1, %v420_v60, %v421_v57  ;;  %v3364_v44 = vpack.i.bf16 %v429_v58, %v427_v19  ;;  %v424_v7 = vsel %vm409_vm1, %v421_v57, %v423_v6 }
  0x3e   : > { %v437_v39 = vsel %vm409_vm1, %v435_v16, %v436_v2  ;;  %v439_v28 = vsel %vm409_vm1, %v436_v2, %v438_v51  ;;  %v445_v37 = vrot.slane %v3119_v42, 2  ;;  %v446_v53 = vrot.slane %v3122_v43, 2 }
  0x3f   : > { %2271 = vrot.lane.b32.xlu1 %v3333_v23, %s2935_s8  ;;  %v448_v8 = vrot.slane %v3133_v48, 2  ;;  %v440_v47 = vrot.slane %v3136_v49, 2  ;;  %v432_v60 = vsel %vm409_vm1, %v430_v40, %v431_v14  ;;  %v434_v6 = vsel %vm409_vm1, %v431_v14, %v433_v22 }
  0x40   : > { %v441_v57 = vrot.slane %v3139_v50, 2  ;;  %v443_v13 = vrot.slane %v3147_v55, 2  ;;  %v3380_v16 = vpack.i.bf16 %v424_v7, %v422_v30  ;;  %v455_v2 = vrot.slane %v3150_v56, 2 }
  0x41   : > { %2266 = vrot.lane.b32.xlu0 %v3343_v34, %s2935_s8  ;;  %v456_v51 = vrot.slane %v3160_v61, 2  ;;  %v458_v48 = vrot.slane %v3163_v62, 2  ;;  %v3387_v19 = vpack.i.bf16 %v439_v28, %v437_v39  ;;  %v3389_v58 = vpack.i.bf16 %v434_v6, %v432_v60 }
  0x42   : > { %v447_v40 = vsel %vm409_vm1, %v445_v37, %v446_v53  ;;  %v449_v55 = vsel %vm409_vm1, %v446_v53, %v448_v8  ;;  %v442_v14 = vsel %vm409_vm1, %v440_v47, %v441_v57  ;;  %v444_v22 = vsel %vm409_vm1, %v441_v57, %v443_v13 }
  0x43   : > { %2281 = vrot.lane.b32.xlu1 %v3354_v63, %s2936_s9  ;;  %v457_v62 = vsel %vm409_vm1, %v455_v2, %v456_v51  ;;  %v451_v30 = vrot.slane %v3173_v10, 2  ;;  %v453_v7 = vrot.slane %v3183_v21, 2  ;;  %v459_v39 = vsel %vm409_vm1, %v456_v51, %v458_v48 }
  0x44   : > { %v465_v28 = vrot.slane %v3190_v29, 2  ;;  %v466_v37 = vrot.slane %v3193_v32, 2  ;;  %v468_v53 = vrot.slane %v3203_v41, 2  ;;  %v3407_v8 = vpack.i.bf16 %v449_v55, %v447_v40 }
  0x45   : > { %2276 = vrot.lane.b32.xlu0 %v2275_v59, %s2936_s9  ;;  %v450_v59 = vrot.slane %v3170_v9, 2  ;;  %v460_v47 = vrot.slane %v3206_v45, 2  ;;  %v461_v60 = vrot.slane %v3209_v46, 2  ;;  %v463_v6 = vrot.slane %v3219_v54, 2 }
  0x46   : > { %4680 = vst [vmem:[#allocation26_spill] sm:$0xff] %v3407_v8  ;;  %v475_v21 = vrot.slane %v3229_v3, 2  ;;  %v476_v57 = vrot.slane %v3232_v4, 2  ;;  %v478_v13 = vrot.slane %v3235_v5, 2  ;;  %v3417_v41 = vpack.i.bf16 %v444_v22, %v442_v14  ;;  %v4682_v22 = vld [vmem:[#allocation16_spill] sm:$0xff] }
  0x47   : > { %2291 = vrot.lane.b32.xlu1 %v3364_v44, %s2936_s9  ;;  %v3419_v2 = vpack.i.bf16 %v459_v39, %v457_v62  ;;  %v452_v51 = vsel %vm409_vm1, %v450_v59, %v451_v30  ;;  %v454_v48 = vsel %vm409_vm1, %v451_v30, %v453_v7  ;;  %v467_v40 = vsel %vm409_vm1, %v465_v28, %v466_v37  ;;  %v4683_v30 = vld [vmem:[#allocation18_spill] sm:$0xff] }
  0x48   : > { %v469_v54 = vsel %vm409_vm1, %v466_v37, %v468_v53  ;;  %v462_v5 = vsel %vm409_vm1, %v460_v47, %v461_v60  ;;  %v464_v55 = vsel %vm409_vm1, %v461_v60, %v463_v6  ;;  %v470_v14 = vrot.slane %v3242_v26, 2  ;;  %v4684_v37 = vld [vmem:[#allocation19_spill] sm:$0xff]  ;;  %v4685_v47 = vld [vmem:[#allocation20_spill] sm:$0xff] }
  0x49   : > { %2286 = vrot.lane.b32.xlu0 %v3380_v16, %s2936_s9  ;;  %4681 = vst [vmem:[#allocation27_spill] sm:$0xff] %v3419_v2  ;;  %v471_v62 = vrot.slane %v4682_v22, 2  ;;  %v477_v39 = vsel %vm409_vm1, %v475_v21, %v476_v57  ;;  %v479_v59 = vsel %vm409_vm1, %v476_v57, %v478_v13  ;;  %v473_v7 = vrot.slane %v4683_v30, 2 }
  0x4a   : > { %v3436_v28 = vpack.i.bf16 %v454_v48, %v452_v51  ;;  %v485_v53 = vrot.slane %v4684_v37, 2  ;;  %v488_v60 = vrot.slane %v3275_v33, 2  ;;  %v3441_v6 = vpack.i.bf16 %v469_v54, %v467_v40  ;;  %v4686_v51 = vld [vmem:[#allocation7_spill] sm:$0xff] }
  0x4b   : > { %2301 = vrot.lane.b32.xlu1 %v3387_v19, %s2936_s9  ;;  %v3443_v23 = vpack.i.bf16 %v464_v55, %v462_v5  ;;  %v3447_v21 = vpack.i.bf16 %v479_v59, %v477_v39  ;;  %v472_v57 = vsel %vm409_vm1, %v470_v14, %v471_v62  ;;  %v474_v13 = vsel %vm409_vm1, %v471_v62, %v473_v7 }
  0x4c   : > { %v480_v54 = vrot.slane %v3291_v38, 2  ;;  %v481_v5 = vrot.slane %v3294_v27, 2  ;;  %v483_v55 = vrot.slane %v3297_v20, 2  ;;  %v3464_v14 = vpack.i.bf16 %v474_v13, %v472_v57 }
  0x4d   : > { %2296 = vrot.lane.b32.xlu0 %v3389_v58, %s2936_s9  ;;  %v2360_v59 = vpack.i.bf16 %v3038_v1, %v3035_v0  ;;  %v2355_v30 = vpack.i.bf16 %v3073_v18, %v3070_v17  ;;  %v3487_v7 = vpack.i.bf16 %v3107_v36, %v3097_v31  ;;  %v3496_v0 = vpack.i.bf16 %v3139_v50, %v3136_v49 }
  0x4e   : > { %v482_v62 = vsel %vm409_vm1, %v480_v54, %v481_v5  ;;  %v484_v39 = vsel %vm409_vm1, %v481_v5, %v483_v55  ;;  %v3501_v1 = vpack.i.bf16 %v3087_v25, %v3084_v24  ;;  %v2400_v17 = vpack.i.bf16 %v3209_v46, %v3206_v45  ;;  %v274_v46 = vld [vmem:[%s3032_s7 + $0x180] sm:$0xff] }
  0x4f   : > { %2311 = vrot.lane.b32.xlu1 %v3407_v8, %s2936_s9  ;;  %v486_v8 = vrot.slane %v4685_v47, 2  ;;  %v3474_v20 = vpack.i.bf16 %v484_v39, %v482_v62  ;;  %v2395_v18 = vpack.i.bf16 %v3160_v61, %v3150_v56  ;;  %v3529_v45 = vpack.i.bf16 %v3294_v27, %v3291_v38  ;;  %v275_v56 = vld [vmem:[%s3032_s7 + $0x188] sm:$0xff]  ;;  %v4687_v39 = vld [vmem:[#allocation5_spill] sm:$0xff] }
  0x50   : > { %v3536_v61 = vpack.i.bf16 %v3232_v4, %v3229_v3  ;;  %v493_v57 = vrot.slane %v274_v46, 1  ;;  %v499_v55 = vrot.slane %v275_v56, 2  ;;  %v498_v62 = vrot.slane %v274_v46, 2 }
  0x51   : > { %2306 = vrot.lane.b32.xlu0 %v3417_v41, %s2936_s9  ;;  %v487_v33 = vsel %vm409_vm1, %v485_v53, %v486_v8  ;;  %v489_v40 = vsel %vm409_vm1, %v486_v8, %v488_v60  ;;  %v2365_v53 = vpack.i.bf16 %v3061_v12, %v3058_v11  ;;  %v2390_v11 = vpack.i.bf16 %v3173_v10, %v3170_v9 }
  0x52   : > { %v3470_v8 = vpack.i.bf16 %v489_v40, %v487_v33  ;;  %v2385_v12 = vpack.i.bf16 %v3122_v43, %v3119_v42  ;;  %v3520_v9 = vpack.i.bf16 %v4682_v22, %v3242_v26  ;;  %v2405_v10 = vpack.i.bf16 %v3193_v32, %v3190_v29  ;;  %v276_v32 = vld [vmem:[%s3032_s7 + $0x190] sm:$0x3] }
  0x53   : > { %2321 = vrot.lane.b32.xlu1 %v3419_v2, %s2936_s9  ;;  %v494_v60 = vrot.slane %v275_v56, 1  ;;  %v3540_v29 = vpack.i.bf16 %v275_v56, %v274_v46  ;;  %v496_v13 = vrot.slane %v276_v32, 1  ;;  %v3547_v33 = vpack.i.bf16 %v4685_v47, %v4684_v37 }
  0x54   : > { %v4693_v56 = vpack.i.bf16 %v4686_v51, %v3281_v52  ;;  %v2835_v52 = vld [vmem:[%s4612_s1] sm:$0xff]  }
  0x55   : > { %2316 = vrot.lane.b32.xlu0 %v3436_v28, %s2936_s9  ;;  %v495_v40 = vsel %vm328_vm0, %v493_v57, %v494_v60  ;;  %v497_v54 = vsel %vm328_vm0, %v494_v60, %v496_v13  ;;  %v4690_v60 = vld [vmem:[#allocation9_spill] sm:$0xff]  ;;  %v4691_v57 = vld [vmem:[#allocation6_spill] sm:$0xff]  ;;  %2088 = vmatprep.subr.bf16.mxu0 %v2835_v52 }
  0x56   : > { %v3553_v5 = vpack.i.bf16 %v497_v54, %v495_v40  ;;  %v4692_v13 = vld [vmem:[#allocation13_spill] sm:$0xff]  ;;  %v500_v54 = vsel %vm409_vm1, %v498_v62, %v499_v55  ;;  %2089 = vmatpush3.bf16.msra.mxu0 %v2835_v52  ;;  %2124 = vmatprep.subr.bf16.mxu1 %v2835_v52 }
  0x57   : > { %2331 = vrot.lane.b32.xlu1 %v3441_v6, %s2936_s9  ;;  %v2445_v40 = vpack.i.bf16 %v4692_v13, %v4691_v57  ;;  %2126 = vmatpush3.bf16.msra.mxu1 %v2835_v52 }
  0x59   : > { %2326 = vrot.lane.b32.xlu0 %v3443_v23, %s2936_s9 }
  0x5b   : > { %2341 = vrot.lane.b32.xlu1 %v3447_v21, %s2936_s9 }
  0x5d   : > { %2336 = vrot.lane.b32.xlu0 %v3464_v14, %s2936_s9 }
  0x5f   : > { %2351 = vrot.lane.b32.xlu1 %v3470_v8, %s2936_s9 }
  0x61   : > { %2346 = vrot.lane.b32.xlu0 %v3474_v20, %s2936_s9 }
  0x63   : > { %2361 = vrot.lane.b32.xlu1 %v2360_v59, %s2937_s10 }
  0x65   : > { %2356 = vrot.lane.b32.xlu0 %v2355_v30, %s2937_s10  ;;  %v4688_v30 = vld [vmem:[#allocation14_spill] sm:$0xff] }
  0x67   : > { %2371 = vrot.lane.b32.xlu1 %v3487_v7, %s2937_s10 }
  0x69   : > { %2366 = vrot.lane.b32.xlu0 %v2365_v53, %s2937_s10 }
  0x6b   : > { %2381 = vrot.lane.b32.xlu1 %v3496_v0, %s2937_s10 }
  0x6d   : > { %2376 = vrot.lane.b32.xlu0 %v3501_v1, %s2937_s10 }
  0x6f   : > { %2391 = vrot.lane.b32.xlu1 %v2390_v11, %s2937_s10  ;;  %v4689_v11 = vld [vmem:[#allocation22_spill] sm:$0xff] }
  0x71   : > { %2386 = vrot.lane.b32.xlu0 %v2385_v12, %s2937_s10  ;;  %v2450_v12 = vpack.i.bf16 %v4689_v11, %v4688_v30  ;;  %v4695_v11 = vld [vmem:[#allocation8_spill] sm:$0xff] }
  0x73   : > { %2401 = vrot.lane.b32.xlu1 %v2400_v17, %s2937_s10 }
  0x75   : > { %2396 = vrot.lane.b32.xlu0 %v2395_v18, %s2937_s10  ;;  %v501_v18 = vrot.slane %v276_v32, 2  ;;  %v2942_v32 = vmov 65535  }
  0x77   : > { %2411 = vrot.lane.b32.xlu1 %v3520_v9, %s2937_s10  ;;  %v502_v48 = vsel %vm409_vm1, %v499_v55, %v501_v18  ;;  %v1636_v55 = vsel %vm1635_vm2, 4294967295, %v2942_v32 }
  0x78   : > { %v3568_v46 = vpack.i.bf16 %v502_v48, %v500_v54  ;;  %v1637_v62 = vsel %vm409_vm1, %v1636_v55, 0  ;;  %v4699_v54 = vld [vmem:[#allocation11_spill] sm:$0xff] }
  0x79   : > { %2406 = vrot.lane.b32.xlu0 %v2405_v10, %s2937_s10 }
  0x7b   : > { %2421 = vrot.lane.b32.xlu1 %v3529_v45, %s2937_s10 }
  0x7d   : > { %2416 = vrot.lane.b32.xlu0 %v3536_v61, %s2937_s10 }
  0x7f   : > { %2431 = vrot.lane.b32.xlu1 %v3540_v29, %s2937_s10 }
  0x81   : > { %2426 = vrot.lane.b32.xlu0 %v3547_v33, %s2937_s10 }
  0x83   : > { %2441 = vrot.lane.b32.xlu1 %v4687_v39, %s2938_s11 }
  0x85   : > { %2436 = vrot.lane.b32.xlu0 %v4690_v60, %s2938_s11 }
  0x87   : > { %2451 = vrot.lane.b32.xlu1 %v2450_v12, %s2938_s11 }
  0x89   : > { %2446 = vrot.lane.b32.xlu0 %v2445_v40, %s2938_s11 }
  0x8b   : > { %2461 = vrot.lane.b32.xlu1 %v3354_v63, %s2939_s12 }
  0x8d   : > { %2456 = vrot.lane.b32.xlu0 %v4693_v56, %s2938_s11 }
  0x8f   : > { %2471 = vrot.lane.b32.xlu1 %v3380_v16, %s2939_s12 }
  0x91   : > { %2466 = vrot.lane.b32.xlu0 %v3419_v2, %s2939_s12 }
  0x93   : > { %2481 = vrot.lane.b32.xlu1 %v2360_v59, %s2940_s13 }
  0x95   : > { %2476 = vrot.lane.b32.xlu0 %v3443_v23, %s2939_s12  ;;  %v3584_v48 = vpop.permute.xlu1 %2206 }
  0x97   : > { %v3586_v63 = vpop.permute.xlu0 %2196  ;;  %2491 = vrot.lane.b32.xlu1 %v2365_v53, %s2940_s13  ;;  %v2836_v53 = vld [vmem:[%s4612_s1 + $0x8] sm:$0x3f]  }
  0x98   : > { %v1639_v12 = vand.u32 %v2836_v53, %v1637_v62 }
  0x99   : > { %2486 = vrot.lane.b32.xlu0 %v2400_v17, %s2940_s13  ;;  %v3593_v51 = vpop.permute.xlu1 %2211 }
  0x9a   : > { %4694 = vst [vmem:[#allocation16_spill] sm:$0xff] %v3593_v51  ;;  %2090 = vmatprep.subr.bf16.mxu0 %v1639_v12  ;;  %2125 = vmatprep.subr.bf16.mxu1 %v1639_v12 }
  0x9b   : > { %v3595_v59 = vpop.permute.xlu0 %2201  ;;  %2501 = vrot.lane.b32.xlu1 %v4687_v39, %s2941_s22  ;;  %2091 = vmatpush3.bf16.msra.mxu0 %v1639_v12 }
  0x9c   : > { %2127 = vmatpush3.bf16.msra.mxu1 %v1639_v12 }
  0x9d   : > { %2496 = vrot.lane.b32.xlu0 %v2405_v10, %s2940_s13  ;;  %v2222_v17 = vpop.permute.xlu1 %2221  ;;  %v4696_v10 = vld [vmem:[#allocation23_spill] sm:$0xff] }
  0x9e   : > { %v2224_v55 = vunpack.i.h.bf16 %v2222_v17  ;;  %v2223_v62 = vunpack.i.l.bf16 %v2222_v17 }
  0x9f   : > { %v2217_v30 = vpop.permute.xlu0 %2216  ;;  %2511 = vrot.lane.b32.xlu1 %v4695_v11, %s2941_s22 }
  0xa0   : > { %v1295_v17 = vsel %vm1284_vm3, %v3084_v24, %v2223_v62 }
  0xa1   : > { %2506 = vrot.lane.b32.xlu0 %v3306_v35, %s2941_s22  ;;  %v3608_v39 = vpop.permute.xlu1 %2231 }
  0xa3   : > { %v3610_v18 = vpop.permute.xlu0 %2226  ;;  %2521 = vrot.lane.b32.xlu1 %v3380_v16, %s2943_s29 }
  0xa5   : > { %2516 = vrot.lane.b32.xlu0 %v4696_v10, %s2941_s22  ;;  %v3616_v60 = vpop.permute.xlu1 %2241 }
  0xa7   : > { %v3618_v57 = vpop.permute.xlu0 %2236  ;;  %2531 = vrot.lane.b32.xlu1 %v3364_v44, %s2943_s29 }
  0xa9   : > { %2526 = vrot.lane.b32.xlu0 %v3443_v23, %s2943_s29  ;;  %v3624_v35 = vpop.permute.xlu1 %2251 }
  0xaa   : > { %4697 = vst [vmem:[#allocation18_spill] sm:$0xff] %v3624_v35  ;;  %v2234_v35 = vunpack.i.h.bf16 %v3608_v39 }
  0xab   : > { %v3626_v13 = vpop.permute.xlu0 %2246  ;;  %2541 = vrot.lane.b32.xlu1 %v4696_v10, %s2938_s11 }
  0xac   : > { %4698 = vst [vmem:[#allocation19_spill] sm:$0xff] %v3626_v13 }
  0xad   : > { %2536 = vrot.lane.b32.xlu0 %v3441_v6, %s2943_s29  ;;  %v3632_v16 = vpop.permute.xlu1 %2261 }
  0xaf   : > { %v3634_v40 = vpop.permute.xlu0 %2256  ;;  %2551 = vrot.lane.b32.xlu1 %v3324_v15, %s2938_s11 }
  0xb1   : > { %2546 = vrot.lane.b32.xlu0 %v4699_v54, %s2938_s11  ;;  %v3640_v23 = vpop.permute.xlu1 %2271 }
  0xb3   : > { %v3642_v56 = vpop.permute.xlu0 %2266  ;;  %2561 = vrot.lane.b32.xlu1 %v3441_v6, %s2939_s12  ;;  %v2218_v6 = vunpack.i.l.bf16 %v2217_v30 }
  0xb5   : > { %2556 = vrot.lane.b32.xlu0 %v3364_v44, %s2939_s12  ;;  %v3648_v52 = vpop.permute.xlu1 %2281  ;;  %v2219_v44 = vunpack.i.h.bf16 %v2217_v30  ;;  %v1293_v24 = vsel %vm1284_vm3, %v3097_v31, %v2218_v6 }
  0xb7   : > { %v3650_v53 = vpop.permute.xlu0 %2276  ;;  %2571 = vrot.lane.b32.xlu1 %v3464_v14, %s2939_s12 }
  0xb9   : > { %2566 = vrot.lane.b32.xlu0 %v3389_v58, %s2939_s12  ;;  %v3656_v32 = vpop.permute.xlu1 %2291 }
  0xba   : > { %4700 = vst [vmem:[#allocation20_spill] sm:$0xff] %v3656_v32  ;;  %v1296_v32 = vsel %vm1284_vm3, %v3087_v25, %v2224_v55  ;;  %v1294_v25 = vsel %vm1284_vm3, %v3107_v36, %v2219_v44  ;;  %v2228_v55 = vunpack.i.l.bf16 %v3610_v18  ;;  %v1300_v36 = vsel %vm1284_vm3, %v3122_v43, %v2234_v35 }
  0xbb   : > { %v3658_v11 = vpop.permute.xlu0 %2286  ;;  %2581 = vrot.lane.b32.xlu1 %v3520_v9, %s2940_s13  ;;  %v2233_v9 = vunpack.i.l.bf16 %v3608_v39  ;;  %v2229_v39 = vunpack.i.h.bf16 %v3610_v18 }
  0xbc   : > { %v1297_v43 = vsel %vm1284_vm3, %v3136_v49, %v2228_v55 }
  0xbd   : > { %2576 = vrot.lane.b32.xlu0 %v3487_v7, %s2940_s13  ;;  %v2302_v12 = vpop.permute.xlu1 %2301  ;;  %v1299_v31 = vsel %vm1284_vm3, %v3119_v42, %v2233_v9  ;;  %v4701_v9 = vld [vmem:[#allocation24_spill] sm:$0xff] }
  0xbe   : > { %v2304_v10 = vunpack.i.h.bf16 %v2302_v12  ;;  %v2303_v13 = vunpack.i.l.bf16 %v2302_v12 }
  0xbf   : > { %v2297_v51 = vpop.permute.xlu0 %2296  ;;  %2591 = vrot.lane.b32.xlu1 %v3536_v61, %s2940_s13 }
  0xc0   : > { %v3673_v7 = vsel %vm1317_vm4, %v1296_v32, %v2304_v10  ;;  %v3676_v30 = vsel %vm1317_vm4, %v1295_v17, %v2303_v13  ;;  %v2299_v12 = vunpack.i.h.bf16 %v2297_v51  ;;  %v2298_v2 = vunpack.i.l.bf16 %v2297_v51 }
  0xc1   : > { %2586 = vrot.lane.b32.xlu0 %v3501_v1, %s2940_s13  ;;  %v2312_v61 = vpop.permute.xlu1 %2311  ;;  %v1298_v10 = vsel %vm1284_vm3, %v3139_v50, %v2229_v39  ;;  %v4702_v50 = vld [vmem:[#allocation10_spill] sm:$0xff]  ;;  %v2258_v39 = vunpack.i.l.bf16 %v3634_v40 }
  0xc2   : > { %v3687_v32 = vsel %vm1317_vm4, %v1293_v24, %v2298_v2  ;;  %v3690_v13 = vsel %vm1317_vm4, %v1294_v25, %v2299_v12  ;;  %v2314_v51 = vunpack.i.h.bf16 %v2312_v61  ;;  %v2313_v62 = vunpack.i.l.bf16 %v2312_v61 }
  0xc3   : > { %v2307_v44 = vpop.permute.xlu0 %2306  ;;  %2601 = vrot.lane.b32.xlu1 %v3324_v15, %s2941_s22  ;;  %v2263_v12 = vunpack.i.l.bf16 %v3632_v16  ;;  %v2259_v24 = vunpack.i.h.bf16 %v3634_v40 }
  0xc4   : > { %v3699_v1 = vsel %vm1317_vm4, %v1300_v36, %v2314_v51  ;;  %v3702_v2 = vsel %vm1317_vm4, %v1299_v31, %v2313_v62  ;;  %v2309_v18 = vunpack.i.h.bf16 %v2307_v44  ;;  %v2308_v6 = vunpack.i.l.bf16 %v2307_v44 }
  0xc5   : > { %2596 = vrot.lane.b32.xlu0 %v4699_v54, %s2941_s22  ;;  %v3710_v42 = vpop.permute.xlu1 %2321  ;;  %v2264_v54 = vunpack.i.h.bf16 %v3632_v16  ;;  %v1311_v16 = vsel %vm1284_vm3, %v3229_v3, %v2263_v12  ;;  %v2274_v36 = vunpack.i.h.bf16 %v3640_v23  ;;  %v1309_v3 = vsel %vm1284_vm3, %v3242_v26, %v2258_v39 }
  0xc6   : > { %v3713_v15 = vsel %vm1317_vm4, %v1297_v43, %v2308_v6  ;;  %v3716_v35 = vsel %vm1317_vm4, %v1298_v10, %v2309_v18  ;;  %v2268_v6 = vunpack.i.l.bf16 %v3642_v56 }
  0xc7   : > { %v3718_v17 = vpop.permute.xlu0 %2316  ;;  %2611 = vrot.lane.b32.xlu1 %v4701_v9, %s2941_s22  ;;  %v1312_v62 = vsel %vm1284_vm3, %v3232_v4, %v2264_v54  ;;  %v1310_v4 = vsel %vm1284_vm3, %v4682_v22, %v2259_v24  ;;  %v1316_v22 = vsel %vm1284_vm3, %v4685_v47, %v2274_v36 }
  0xc8   : > { %v1313_v47 = vsel %vm1284_vm3, %v3291_v38, %v2268_v6 }
  0xc9   : > { %2606 = vrot.lane.b32.xlu0 %v4702_v50, %s2941_s22  ;;  %v3724_v49 = vpop.permute.xlu1 %2331 }
  0xcb   : > { %v3728_v25 = vpop.permute.xlu0 %2326  ;;  %2621 = vrot.lane.b32.xlu1 %v3464_v14, %s2943_s29  ;;  %v2273_v14 = vunpack.i.l.bf16 %v3640_v23  ;;  %v2269_v23 = vunpack.i.h.bf16 %v3642_v56 }
  0xcd   : > { %2616 = vrot.lane.b32.xlu0 %v3389_v58, %s2943_s29  ;;  %v2342_v55 = vpop.permute.xlu1 %2341  ;;  %v1315_v26 = vsel %vm1284_vm3, %v4684_v37, %v2273_v14 }
  0xce   : > { %v2344_v61 = vunpack.i.h.bf16 %v2342_v55  ;;  %v2343_v51 = vunpack.i.l.bf16 %v2342_v55 }
  0xcf   : > { %v2337_v31 = vpop.permute.xlu0 %2336  ;;  %2631 = vrot.lane.b32.xlu1 %v3447_v21, %s2943_s29 }
  0xd0   : > { %v3745_v40 = vsel %vm1317_vm4, %v1312_v62, %v2344_v61  ;;  %v3748_v58 = vsel %vm1317_vm4, %v1311_v16, %v2343_v51  ;;  %v2339_v44 = vunpack.i.h.bf16 %v2337_v31  ;;  %v2338_v18 = vunpack.i.l.bf16 %v2337_v31 }
  0xd1   : > { %2626 = vrot.lane.b32.xlu0 %v3387_v19, %s2943_s29  ;;  %v2352_v10 = vpop.permute.xlu1 %2351  ;;  %v1314_v62 = vsel %vm1284_vm3, %v3294_v27, %v2269_v23  ;;  %v4703_v27 = vld [vmem:[#allocation15_spill] sm:$0xff] }
  0xd2   : > { %v3759_v43 = vsel %vm1317_vm4, %v1309_v3, %v2338_v18  ;;  %v3762_v54 = vsel %vm1317_vm4, %v1310_v4, %v2339_v44  ;;  %v2354_v12 = vunpack.i.h.bf16 %v2352_v10  ;;  %v2353_v55 = vunpack.i.l.bf16 %v2352_v10 }
  0xd3   : > { %v2347_v24 = vpop.permute.xlu0 %2346  ;;  %2641 = vrot.lane.b32.xlu1 %v4701_v9, %s2938_s11 }
  0xd4   : > { %v3771_v56 = vsel %vm1317_vm4, %v1316_v22, %v2354_v12  ;;  %v3774_v39 = vsel %vm1317_vm4, %v1315_v26, %v2353_v55  ;;  %v2349_v61 = vunpack.i.h.bf16 %v2347_v24  ;;  %v2348_v51 = vunpack.i.l.bf16 %v2347_v24  ;;  %v2837_v24 = vld [vmem:[%s3032_s7 + $0xa8] sm:$0xff] }
  0xd5   : > { %2636 = vrot.lane.b32.xlu0 %v4702_v50, %s2938_s11  ;;  %v3782_v37 = vpop.permute.xlu1 %2361 }
  0xd6   : > { %v3785_v9 = vsel %vm1317_vm4, %v1313_v47, %v2348_v51  ;;  %v3788_v16 = vsel %vm1317_vm4, %v1314_v62, %v2349_v61  ;;  %v2838_v61 = vld [vmem:[%s3032_s7 + $0xb0] sm:$0xff] }
  0xd7   : > { %v3790_v36 = vpop.permute.xlu0 %2356  ;;  %2651 = vrot.lane.b32.xlu1 %v3343_v34, %s2938_s11  ;;  %v2685_v51 = vpack.i.bf16 %v2838_v61, %v2837_v24  ;;  %v3911_v61 = vld [vmem:[%s3032_s7 + $0x198] sm:$0xff] }
  0xd9   : > { %2646 = vrot.lane.b32.xlu0 %v4703_v27, %s2938_s11  ;;  %v3796_v38 = vpop.permute.xlu1 %2371 }
  0xdb   : > { %v3798_v14 = vpop.permute.xlu0 %2366  ;;  %2661 = vrot.lane.b32.xlu1 %v3447_v21, %s2939_s12 }
  0xdd   : > { %2656 = vrot.lane.b32.xlu0 %v3387_v19, %s2939_s12  ;;  %v2382_v50 = vpop.permute.xlu1 %2381 }
  0xde   : > { %v2384_v31 = vunpack.i.h.bf16 %v2382_v50  ;;  %v2383_v44 = vunpack.i.l.bf16 %v2382_v50 }
  0xdf   : > { %v2377_v18 = vpop.permute.xlu0 %2376  ;;  %2671 = vrot.lane.b32.xlu1 %v3474_v20, %s2939_s12 }
  0xe0   : > { %v3808_v4 = vsel %vm1350_vm5, %v3676_v30, %v2383_v44  ;;  %v3812_v3 = vsel %vm1350_vm5, %v3673_v7, %v2384_v31  ;;  %v2379_v21 = vunpack.i.h.bf16 %v2377_v18  ;;  %v2378_v23 = vunpack.i.l.bf16 %v2377_v18  ;;  %v4712_v31 = vld [vmem:[#allocation25_spill] sm:$0xff] }
  0xe1   : > { %4704 = vst [vmem:[#allocation7_spill] sm:$0xff] %v3808_v4  ;;  %4705 = vst [vmem:[#allocation5_spill] sm:$0xff] %v3812_v3  ;;  %2666 = vrot.lane.b32.xlu0 %v3417_v41, %s2939_s12  ;;  %v2392_v19 = vpop.permute.xlu1 %2391  ;;  %v2845_v4 = vld [vmem:[%s3032_s7] sm:$0xff] }
  0xe2   : > { %v3818_v6 = vsel %vm1350_vm5, %v3687_v32, %v2378_v23  ;;  %v3822_v30 = vsel %vm1350_vm5, %v3690_v13, %v2379_v21  ;;  %v2394_v10 = vunpack.i.h.bf16 %v2392_v19  ;;  %v2393_v12 = vunpack.i.l.bf16 %v2392_v19  ;;  %v4715_v21 = vld [vmem:[#allocation12_spill] sm:$0xff]  ;;  %v2846_v3 = vld [vmem:[%s3032_s7 + $0x20] sm:$0xff] }
  0xe3   : > { %4706 = vst [vmem:[#allocation14_spill] sm:$0xff] %v3818_v6  ;;  %4707 = vst [vmem:[#allocation22_spill] sm:$0xff] %v3822_v30  ;;  %v2387_v7 = vpop.permute.xlu0 %2386  ;;  %2681 = vrot.lane.b32.xlu1 %v3529_v45, %s2940_s13  ;;  %v2283_v6 = vunpack.i.l.bf16 %v3648_v52 }
  0xe4   : > { %v3828_v55 = vsel %vm1350_vm5, %v3702_v2, %v2393_v12  ;;  %v3832_v22 = vsel %vm1350_vm5, %v3699_v1, %v2394_v10  ;;  %v2389_v32 = vunpack.i.h.bf16 %v2387_v7  ;;  %v2388_v26 = vunpack.i.l.bf16 %v2387_v7 }
  0xe5   : > { %4708 = vst [vmem:[#allocation9_spill] sm:$0xff] %v3828_v55  ;;  %4709 = vst [vmem:[#allocation6_spill] sm:$0xff] %v3832_v22  ;;  %2676 = vrot.lane.b32.xlu0 %v3496_v0, %s2940_s13  ;;  %v3836_v13 = vpop.permute.xlu1 %2401  ;;  %v2198_v55 = vunpack.i.l.bf16 %v3586_v63 }
  0xe6   : > { %v3842_v45 = vsel %vm1350_vm5, %v3713_v15, %v2388_v26  ;;  %v3846_v2 = vsel %vm1350_vm5, %v3716_v35, %v2389_v32 }
  0xe7   : > { %4710 = vst [vmem:[#allocation13_spill] sm:$0xff] %v3842_v45  ;;  %4711 = vst [vmem:[#allocation8_spill] sm:$0xff] %v3846_v2  ;;  %v3848_v1 = vpop.permute.xlu0 %2396  ;;  %2691 = vrot.lane.b32.xlu1 %v3547_v33, %s2940_s13  ;;  %v1285_v22 = vsel %vm1284_vm3, %v2845_v4, %v2198_v55 }
  0xe9   : > { %2686 = vrot.lane.b32.xlu0 %v2685_v51, %s2940_s13  ;;  %v3853_v0 = vpop.permute.xlu1 %2411  ;;  %v3914_v51 = vld [vmem:[%s3032_s7 + $0x1a0] sm:$0xff] }
  0xeb   : > { %v3855_v62 = vpop.permute.xlu0 %2406  ;;  %2701 = vrot.lane.b32.xlu1 %v3343_v34, %s2941_s22 }
  0xed   : > { %2696 = vrot.lane.b32.xlu0 %v4703_v27, %s2941_s22  ;;  %v2422_v15 = vpop.permute.xlu1 %2421 }
  0xee   : > { %v2424_v35 = vunpack.i.h.bf16 %v2422_v15  ;;  %v2423_v47 = vunpack.i.l.bf16 %v2422_v15  ;;  %v4721_v15 = vld [vmem:[#allocation26_spill] sm:$0xff] }
  0xef   : > { %v2417_v50 = vpop.permute.xlu0 %2416  ;;  %2711 = vrot.lane.b32.xlu1 %v4712_v31, %s2941_s22 }
  0xf0   : > { %v3865_v33 = vsel %vm1350_vm5, %v3748_v58, %v2423_v47  ;;  %v3869_v44 = vsel %vm1350_vm5, %v3745_v40, %v2424_v35  ;;  %v2419_v18 = vunpack.i.h.bf16 %v2417_v50  ;;  %v2418_v34 = vunpack.i.l.bf16 %v2417_v50 }
  0xf1   : > { %4713 = vst [vmem:[#allocation23_spill] sm:$0xff] %v3865_v33  ;;  %4714 = vst [vmem:[#allocation11_spill] sm:$0xff] %v3869_v44  ;;  %2706 = vrot.lane.b32.xlu0 %v4715_v21, %s2941_s22  ;;  %v2432_v27 = vpop.permute.xlu1 %2431  ;;  %v507_v35 = vrot.slane %v3914_v51, 1  ;;  %v506_v47 = vrot.slane %v3911_v61, 1  ;;  %v2847_v33 = vld [vmem:[%s3032_s7 + $0x18] sm:$0xff] }
  0xf2   : > { %v3875_v23 = vsel %vm1350_vm5, %v3759_v43, %v2418_v34  ;;  %v3879_v19 = vsel %vm1350_vm5, %v3762_v54, %v2419_v18  ;;  %v2434_v58 = vunpack.i.h.bf16 %v2432_v27  ;;  %v2433_v10 = vunpack.i.l.bf16 %v2432_v27  ;;  %v2839_v18 = vld [vmem:[%s3032_s7 + $0x30] sm:$0xff] }
  0xf3   : > { %4716 = vst [vmem:[#allocation24_spill] sm:$0xff] %v3879_v19  ;;  %v2427_v40 = vpop.permute.xlu0 %2426  ;;  %2721 = vrot.lane.b32.xlu1 %v3474_v20, %s2943_s29 }
  0xf4   : > { %v3885_v12 = vsel %vm1350_vm5, %v3774_v39, %v2433_v10  ;;  %v3889_v43 = vsel %vm1350_vm5, %v3771_v56, %v2434_v58  ;;  %v2429_v7 = vunpack.i.h.bf16 %v2427_v40  ;;  %v2428_v32 = vunpack.i.l.bf16 %v2427_v40  ;;  %v279_v39 = vld [vmem:[%s3032_s7 + $0x1a8] sm:$0x3] }
  0xf5   : > { %4717 = vst [vmem:[#allocation10_spill] sm:$0xff] %v3885_v12  ;;  %4718 = vst [vmem:[#allocation15_spill] sm:$0xff] %v3889_v43  ;;  %2716 = vrot.lane.b32.xlu0 %v3417_v41, %s2943_s29  ;;  %v3893_v54 = vpop.permute.xlu1 %2441  ;;  %v2208_v56 = vunpack.i.l.bf16 %v3584_v48  ;;  %v2288_v41 = vunpack.i.l.bf16 %v3658_v11  ;;  %v509_v50 = vrot.slane %v279_v39, 1  ;;  %v512_v40 = vrot.slane %v3914_v51, 2 }
  0xf6   : > { %v3897_v26 = vsel %vm1350_vm5, %v3785_v9, %v2428_v32  ;;  %v3901_v20 = vsel %vm1350_vm5, %v3788_v16, %v2429_v7  ;;  %v2368_v9 = vunpack.i.l.bf16 %v3798_v14  ;;  %v511_v7 = vrot.slane %v3911_v61, 2 }
  0xf7   : > { %4719 = vst [vmem:[#allocation25_spill] sm:$0xff] %v3897_v26  ;;  %4720 = vst [vmem:[#allocation12_spill] sm:$0xff] %v3901_v20  ;;  %v3905_v24 = vpop.permute.xlu0 %2436  ;;  %2731 = vrot.lane.b32.xlu1 %v3470_v8, %s2943_s29  ;;  %v1289_v34 = vsel %vm1284_vm3, %v2839_v18, %v2208_v56  ;;  %v3939_v18 = vsel %vm328_vm0, %v506_v47, %v507_v35  ;;  %v2204_v47 = vunpack.i.h.bf16 %v3595_v59  ;;  %v2243_v43 = vunpack.i.l.bf16 %v3616_v60  ;;  %v2844_v20 = vld [vmem:[%s3032_s7 + $0x8] sm:$0xff] }
  0xf8   : > { %v1322_v58 = vsel %vm1317_vm4, %v1289_v34, %v2288_v41  ;;  %v514_v41 = vrot.slane %v279_v39, 2  ;;  %v2199_v34 = vunpack.i.h.bf16 %v3586_v63  ;;  %v2239_v12 = vunpack.i.h.bf16 %v3618_v57  ;;  %v4722_v63 = vld [vmem:[#allocation21_spill] sm:$0xff] }
  0xf9   : > { %2726 = vrot.lane.b32.xlu0 %v4721_v15, %s2943_s29  ;;  %v3919_v16 = vpop.permute.xlu1 %2451  ;;  %v1355_v32 = vsel %vm1350_vm5, %v1322_v58, %v2368_v9  ;;  %v3950_v58 = vld [vmem:[%s3032_s7 + $0xc0] sm:$0xff]  ;;  %v3983_v45 = vsel %vm409_vm1, %v511_v7, %v512_v40  ;;  %v1288_v44 = vsel %vm1284_vm3, %v2846_v3, %v2204_v47  ;;  %v2284_v7 = vunpack.i.h.bf16 %v3648_v52 }
  0xfa   : > { %v1286_v26 = vsel %vm1284_vm3, %v2844_v20, %v2199_v34  ;;  %v2279_v52 = vunpack.i.h.bf16 %v3650_v53  ;;  %v2324_v20 = vunpack.i.h.bf16 %v3710_v42  ;;  %v2323_v34 = vunpack.i.l.bf16 %v3710_v42 }
  0xfb   : > { %v3925_v27 = vpop.permute.xlu0 %2446  ;;  %2741 = vrot.lane.b32.xlu1 %v4712_v31, %s2938_s11  ;;  %v3942_v31 = vsel %vm328_vm0, %v507_v35, %v509_v50  ;;  %v2203_v35 = vunpack.i.l.bf16 %v3595_v59  ;;  %v3966_v50 = vld [vmem:[%s3032_s7 + $0xd8] sm:$0xff]  ;;  %v2244_v59 = vunpack.i.h.bf16 %v3616_v60  ;;  %v2238_v60 = vunpack.i.l.bf16 %v3618_v57 }
  0xfc   : > { %v2448_v10 = vunpack.i.l.bf16 %v3925_v27  ;;  %v2278_v57 = vunpack.i.l.bf16 %v3650_v53  ;;  %v1303_v55 = vsel %vm1284_vm3, %v3966_v50, %v2243_v43  ;;  %v2319_v47 = vunpack.i.h.bf16 %v3718_v17 }
  0xfd   : > { %2736 = vrot.lane.b32.xlu0 %v4715_v21, %s2938_s11  ;;  %v3936_v56 = vpop.permute.xlu1 %2461  ;;  %v3953_v21 = vld [vmem:[%s3032_s7 + $0xc8] sm:$0xff]  ;;  %v1287_v30 = vsel %vm1284_vm3, %v2847_v33, %v2203_v35  ;;  %v2318_v43 = vunpack.i.l.bf16 %v3718_v17  ;;  %v1321_v53 = vsel %vm1317_vm4, %v1288_v44, %v2284_v7  ;;  %v2364_v35 = vunpack.i.h.bf16 %v3782_v37 }
  0xfe   : > { %v3947_v9 = vsel %vm1383_vm6, %v1355_v32, %v2448_v10  ;;  %v3969_v10 = vld [vmem:[%s3032_s7 + $0xe0] sm:$0xff]  ;;  %v3986_v32 = vsel %vm409_vm1, %v512_v40, %v514_v41  ;;  %v1302_v33 = vsel %vm1284_vm3, %v3953_v21, %v2239_v12  ;;  %v1301_v41 = vsel %vm1284_vm3, %v3950_v58, %v2238_v60 }
  0xff   : > { %v3959_v39 = vpop.permute.xlu0 %2456  ;;  %2751 = vrot.lane.b32.xlu1 %v3553_v5, %s2938_s11  ;;  %v1304_v4 = vsel %vm1284_vm3, %v3969_v10, %v2244_v59  ;;  %v1320_v12 = vsel %vm1317_vm4, %v1287_v30, %v2283_v6  ;;  %v2363_v59 = vunpack.i.l.bf16 %v3782_v37  ;;  %v1318_v42 = vsel %vm1317_vm4, %v1285_v22, %v2278_v57 }
 0x100   : > { %v2359_v60 = vunpack.i.h.bf16 %v3790_v36  ;;  %v2358_v17 = vunpack.i.l.bf16 %v3790_v36  ;;  %v2403_v6 = vunpack.i.l.bf16 %v3836_v13  ;;  %v1319_v30 = vsel %vm1317_vm4, %v1286_v26, %v2279_v52 }
 0x101   : > { %2746 = vrot.lane.b32.xlu0 %v4722_v63, %s2938_s11  ;;  %v3980_v2 = vpop.permute.xlu1 %2471  ;;  %v1337_v44 = vsel %vm1317_vm4, %v1304_v4, %v2324_v20  ;;  %v2404_v37 = vunpack.i.h.bf16 %v3836_v13  ;;  %v2398_v7 = vunpack.i.l.bf16 %v3848_v1  ;;  %v1336_v22 = vsel %vm1317_vm4, %v1303_v55, %v2323_v34  ;;  %s2069_s11 = sshll.u32 %s2925_s18, 12 }
 0x102   : > { %v1334_v36 = vsel %vm1317_vm4, %v1301_v41, %v2318_v43  ;;  %v1335_v57 = vsel %vm1317_vm4, %v1302_v33, %v2319_v47  ;;  %v2399_v26 = vunpack.i.h.bf16 %v3848_v1  ;;  %v1353_v4 = vsel %vm1350_vm5, %v1320_v12, %v2363_v59  ;;  %s4555_s14 = scalar_lea.hbm %s4615_s4, %s2069_s11 }
 0x103   : > { %v3999_v40 = vpop.permute.xlu0 %2466  ;;  %2761 = vrot.lane.b32.xlu1 %v3470_v8, %s2939_s12  ;;  %v1354_v13 = vsel %vm1350_vm5, %v1321_v53, %v2364_v35  ;;  %v2444_v52 = vunpack.i.h.bf16 %v3893_v54  ;;  %v2443_v20 = vunpack.i.l.bf16 %v3893_v54  ;;  %v1351_v55 = vsel %vm1350_vm5, %v1318_v42, %v2358_v17 }
 0x104   : > { %v1352_v33 = vsel %vm1350_vm5, %v1319_v30, %v2359_v60  ;;  %v4058_v1 = vsel %vm1350_vm5, %v1336_v22, %v2403_v6  ;;  %v2438_v41 = vunpack.i.l.bf16 %v3905_v24  ;;  %v4062_v34 = vsel %vm1350_vm5, %v1337_v44, %v2404_v37 }
 0x105   : > { %2756 = vrot.lane.b32.xlu0 %v4721_v15, %s2939_s12  ;;  %v4016_v8 = vpop.permute.xlu1 %2481  ;;  %v1367_v54 = vsel %vm1350_vm5, %v1334_v36, %v2398_v7  ;;  %v2439_v47 = vunpack.i.h.bf16 %v3905_v24  ;;  %v2453_v43 = vunpack.i.l.bf16 %v3919_v16  ;;  %v1368_v53 = vsel %vm1350_vm5, %v1335_v57, %v2399_v26 }
 0x106   : > { %v2449_v35 = vunpack.i.h.bf16 %v3925_v27  ;;  %v2464_v59 = vunpack.i.h.bf16 %v3936_v56  ;;  %v2463_v42 = vunpack.i.l.bf16 %v3936_v56  ;;  %v1386_v60 = vsel %vm1383_vm6, %v1353_v4, %v2443_v20 }
 0x107   : > { %v4027_v15 = vpop.permute.xlu0 %2476  ;;  %2771 = vrot.lane.b32.xlu1 %v3568_v46, %s2939_s12  ;;  %v1387_v24 = vsel %vm1383_vm6, %v1354_v13, %v2444_v52  ;;  %v2474_v17 = vunpack.i.h.bf16 %v3980_v2  ;;  %v2473_v6 = vunpack.i.l.bf16 %v3980_v2  ;;  %v1384_v27 = vsel %vm1383_vm6, %v1351_v55, %v2438_v41 }
 0x108   : > { %v2469_v30 = vunpack.i.h.bf16 %v3999_v40  ;;  %v2468_v56 = vunpack.i.l.bf16 %v3999_v40  ;;  %v2483_v44 = vunpack.i.l.bf16 %v4016_v8  ;;  %v1385_v37 = vsel %vm1383_vm6, %v1352_v33, %v2439_v47 }
 0x109   : > { %2766 = vrot.lane.b32.xlu0 %v3436_v28, %s2939_s12  ;;  %v4041_v3 = vpop.permute.xlu1 %2491  ;;  %v2454_v2 = vunpack.i.h.bf16 %v3919_v16  ;;  %v1401_v7 = vsel %vm1383_vm6, %v1368_v53, %v2453_v43  ;;  %v2484_v22 = vunpack.i.h.bf16 %v4016_v8  ;;  %v1400_v36 = vsel %vm1383_vm6, %v1367_v54, %v2449_v35 }
 0x10a   : > { %v1417_v40 = vsel %vm1416_vm7, %v1384_v27, %v2463_v42  ;;  %v1418_v57 = vsel %vm1416_vm7, %v1385_v37, %v2464_v59  ;;  %v2458_v4 = vunpack.i.l.bf16 %v3959_v39  ;;  %v1419_v13 = vsel %vm1416_vm7, %v1386_v60, %v2473_v6 }
 0x10b   : > { %v4051_v19 = vpop.permute.xlu0 %2486  ;;  %2781 = vrot.lane.b32.xlu1 %v3540_v29, %s2940_s13  ;;  %v4723_v29 = vpack.i.bf16 %v3953_v21, %v3950_v58  ;;  %v4724_v21 = vpack.i.bf16 %v3914_v51, %v3911_v61  ;;  %v4725_v61 = vpack.i.bf16 %v3969_v10, %v3966_v50  ;;  %v1420_v52 = vsel %vm1416_vm7, %v1387_v24, %v2474_v17 }
 0x10c   : > { %v1433_v50 = vsel %vm1416_vm7, %v1400_v36, %v2468_v56  ;;  %v1434_v10 = vsel %vm1416_vm7, %v1401_v7, %v2469_v30  ;;  %v1450_v55 = vsel %vm1449_vm8, %v1417_v40, %v2483_v44  ;;  %v2493_v33 = vunpack.i.l.bf16 %v4041_v3  ;;  %v4727_v44 = vld [vmem:[#allocation17_spill] sm:$0xff] }
 0x10d   : > { %2776 = vrot.lane.b32.xlu0 %v4723_v29, %s2940_s13  ;;  %v2502_v12 = vpop.permute.xlu1 %2501  ;;  %v1451_v41 = vsel %vm1449_vm8, %v1418_v57, %v2484_v22  ;;  %v2479_v54 = vunpack.i.h.bf16 %v4027_v15  ;;  %v2494_v47 = vunpack.i.h.bf16 %v4041_v3  ;;  %v2488_v43 = vunpack.i.l.bf16 %v4051_v19 }
 0x10e   : > { %v2503_v26 = vunpack.i.l.bf16 %v2502_v12  ;;  %v2504_v8 = vunpack.i.h.bf16 %v2502_v12  ;;  %v2489_v29 = vunpack.i.h.bf16 %v4051_v19  ;;  %v4726_v3 = vpack.i.bf16 %v3942_v31, %v3939_v18 }
 0x10f   : > { %v4079_v58 = vpop.permute.xlu0 %2496  ;;  %2791 = vrot.lane.b32.xlu1 %v4724_v21, %s2940_s13  ;;  %v1452_v6 = vsel %vm1449_vm8, %v1419_v13, %v2493_v33  ;;  %v1453_v27 = vsel %vm1449_vm8, %v1420_v52, %v2494_v47  ;;  %v1466_v30 = vsel %vm1449_vm8, %v1433_v50, %v2488_v43  ;;  %v1403_v33 = vsel %vm1383_vm6, %v4062_v34, %v2458_v4 }
 0x110   : > { %v1483_v35 = vsel %vm1482_vm9, %v1450_v55, %v2503_v26  ;;  %v1484_v17 = vsel %vm1482_vm9, %v1451_v41, %v2504_v8  ;;  %v1467_v37 = vsel %vm1449_vm8, %v1434_v10, %v2489_v29  ;;  %v1402_v55 = vsel %vm1383_vm6, %v4058_v1, %v2454_v2 }
 0x111   : > { %2786 = vrot.lane.b32.xlu0 %v4725_v61, %s2940_s13  ;;  %v2512_v51 = vpop.permute.xlu1 %2511  ;;  %v2498_v61 = vunpack.i.l.bf16 %v4079_v58  ;;  %v4728_v29 = vpack.i.bf16 %v3986_v32, %v3983_v45 }
 0x112   : > { %v2514_v59 = vunpack.i.h.bf16 %v2512_v51  ;;  %v2513_v42 = vunpack.i.l.bf16 %v2512_v51 }
 0x113   : > { %v2507_v20 = vpop.permute.xlu0 %2506  ;;  %2801 = vrot.lane.b32.xlu1 %v3553_v5, %s2941_s22 }
 0x114   : > { %v2508_v60 = vunpack.i.l.bf16 %v2507_v20  ;;  %v2509_v56 = vunpack.i.h.bf16 %v2507_v20  ;;  %v1485_v51 = vsel %vm1482_vm9, %v1452_v6, %v2513_v42  ;;  %v1486_v36 = vsel %vm1482_vm9, %v1453_v27, %v2514_v59  ;;  %v4731_v6 = vld [vmem:[#allocation18_spill] sm:$0xff] }
 0x115   : > { %2796 = vrot.lane.b32.xlu0 %v4722_v63, %s2941_s22  ;;  %v2522_v5 = vpop.permute.xlu1 %2521  ;;  %v2478_v63 = vunpack.i.l.bf16 %v4027_v15  ;;  %v2499_v15 = vunpack.i.h.bf16 %v4079_v58  ;;  %v2253_v27 = vunpack.i.l.bf16 %v4731_v6 }
 0x116   : > { %v2524_v12 = vunpack.i.h.bf16 %v2522_v5  ;;  %v2523_v53 = vunpack.i.l.bf16 %v2522_v5  ;;  %v1499_v57 = vsel %vm1482_vm9, %v1466_v30, %v2508_v60  ;;  %v4732_v30 = vld [vmem:[#allocation19_spill] sm:$0xff] }
 0x117   : > { %v2517_v24 = vpop.permute.xlu0 %2516  ;;  %2811 = vrot.lane.b32.xlu1 %v4726_v3, %s2941_s22  ;;  %v1435_v43 = vsel %vm1416_vm7, %v1402_v55, %v2478_v63  ;;  %v4730_v3 = vld [vmem:[#allocation16_spill] sm:$0xff] }
 0x118   : > { %v1516_v19 = vsel %vm1515_vm10, %v1483_v35, %v2523_v53  ;;  %v1517_v21 = vsel %vm1515_vm10, %v1484_v17, %v2524_v12  ;;  %v2519_v20 = vunpack.i.h.bf16 %v2517_v24  ;;  %v2518_v58 = vunpack.i.l.bf16 %v2517_v24 }
 0x119   : > { %2806 = vrot.lane.b32.xlu0 %v4727_v44, %s2941_s22  ;;  %v2532_v18 = vpop.permute.xlu1 %2531  ;;  %v1548_v31 = vpack.c.bf16 %v1517_v21, %v1516_v19  ;;  %v1468_v1 = vsel %vm1449_vm8, %v1435_v43, %v2498_v61  ;;  %v2209_v24 = vunpack.i.h.bf16 %v3584_v48  ;;  %v2214_v17 = vunpack.i.h.bf16 %v4730_v3  ;;  %v2849_v61 = vld [vmem:[%s3032_s7 + $0x50] sm:$0xff] }
 0x11a   : > { %v2534_v7 = vunpack.i.h.bf16 %v2532_v18  ;;  %v2533_v22 = vunpack.i.l.bf16 %v2532_v18  ;;  %v1501_v12 = vsel %vm1482_vm9, %v1468_v1, %v2518_v58  ;;  %v2213_v63 = vunpack.i.l.bf16 %v4730_v3  ;;  %v4733_v18 = vld [vmem:[#allocation20_spill] sm:$0xff]  ;;  %v2852_v58 = vld [vmem:[%s3032_s7 + $0x108] sm:$0xff] }
 0x11b   : > { %v2527_v40 = vpop.permute.xlu0 %2526  ;;  %2821 = vrot.lane.b32.xlu1 %v3568_v46, %s2943_s29  ;;  %2092 = vmatprep.mubr.msk.bf16.mxu0 %vm1586_vm11, %v1548_v31  ;;  %v1500_v46 = vsel %vm1482_vm9, %v1467_v37, %v2509_v56  ;;  %v2254_v19 = vunpack.i.h.bf16 %v4731_v6  ;;  %v2249_v56 = vunpack.i.h.bf16 %v4732_v30  ;;  %v2248_v44 = vunpack.i.l.bf16 %v4732_v30 }
 0x11c   : > { %v1518_v26 = vsel %vm1515_vm10, %v1485_v51, %v2533_v22  ;;  %v1519_v13 = vsel %vm1515_vm10, %v1486_v36, %v2534_v7  ;;  %v2529_v52 = vunpack.i.h.bf16 %v2527_v40  ;;  %v2528_v8 = vunpack.i.l.bf16 %v2527_v40  ;;  %v2848_v7 = vld [vmem:[%s3032_s7 + $0x38] sm:$0xff] }
 0x11d   : > { %v1549_v50 = vpack.c.bf16 %v1519_v13, %v1518_v26  ;;  %2816 = vrot.lane.b32.xlu0 %v3436_v28, %s2943_s29  ;;  %v4143_v10 = vpop.permute.xlu1 %2541  ;;  %v1436_v28 = vsel %vm1416_vm7, %v1403_v33, %v2479_v54  ;;  %v4729_v54 = vld [vmem:[#allocation27_spill] sm:$0xff]  ;;  %v2294_v31 = vunpack.i.h.bf16 %v4733_v18  ;;  %v2293_v48 = vunpack.i.l.bf16 %v4733_v18 }
 0x11e   : > { %v1532_v41 = vsel %vm1515_vm10, %v1499_v57, %v2528_v8  ;;  %v1533_v47 = vsel %vm1515_vm10, %v1500_v46, %v2529_v52  ;;  %v1469_v34 = vsel %vm1449_vm8, %v1436_v28, %v2499_v15  ;;  %v2289_v37 = vunpack.i.h.bf16 %v3658_v11  ;;  %v2850_v57 = vld [vmem:[%s3032_s7 + $0x48] sm:$0xff]  ;;  %v2851_v13 = vld [vmem:[%s3032_s7 + $0x110] sm:$0xff]  ;;  %v2853_v46 = vld [vmem:[%s3032_s7 + $0xf8] sm:$0xff] }
 0x11f   : > { %v2537_v5 = vpop.permute.xlu0 %2536  ;;  %2831 = vrot.lane.b32.xlu1 %v4728_v29, %s2943_s29  ;;  %2093 = vmatmul.mubr.msk.bf16.vlgmr.msra.gmra.mrb[0].mxu0 %vm1586_vm11, %v1549_v50  ;;  %v1556_v16 = vpack.c.bf16 %v1533_v47, %v1532_v41  ;;  %v1502_v53 = vsel %vm1482_vm9, %v1469_v34, %v2519_v20  ;;  %v1290_v22 = vsel %vm1284_vm3, %v2848_v7, %v2209_v24  ;;  %v2334_v36 = vunpack.i.h.bf16 %v3724_v49  ;;  %v2854_v33 = vld [vmem:[%s3032_s7 + $0xf0] sm:$0xff]  ;;  %s2042_s7 = sshll.u32 %s212_s30, 8 }
 0x120   : > { %v2539_v2 = vunpack.i.h.bf16 %v2537_v5  ;;  %v2538_v4 = vunpack.i.l.bf16 %v2537_v5  ;;  %v1292_v51 = vsel %vm1284_vm3, %v2849_v61, %v2214_v17  ;;  %v2333_v40 = vunpack.i.l.bf16 %v3724_v49  ;;  %s4431_s10 = scalar_lea.vmem [#allocation2], %s2042_s7 }
 0x121   : > { %2826 = vrot.lane.b32.xlu0 %v4729_v54, %s2943_s29  ;;  %2108 = vmatprep.mubr.msk.bf16.mxu1 %vm1586_vm11, %v1556_v16  ;;  %v4168_v45 = vpop.permute.xlu1 %2551  ;;  %v1291_v26 = vsel %vm1284_vm3, %v2850_v57, %v2213_v63  ;;  %v1308_v11 = vsel %vm1284_vm3, %v2851_v13, %v2254_v19  ;;  %v2329_v52 = vunpack.i.h.bf16 %v3728_v25  ;;  %v2328_v8 = vunpack.i.l.bf16 %v3728_v25  ;;  %s1955_s12 = sshll.u32 %s4431_s10, 4  ;;  %s2861_s29 = scalar_lea.vmem %s2860_s26, 8192  ;;  %s4557_s12 = int_to_ptr.vmem [resolvable:$true] %s1955_s12 }
 0x122   : > { %v1534_v32 = vsel %vm1515_vm10, %v1501_v12, %v2538_v4  ;;  %v1535_v35 = vsel %vm1515_vm10, %v1502_v53, %v2539_v2  ;;  %v1307_v50 = vsel %vm1284_vm3, %v2852_v58, %v2253_v27  ;;  %v1306_v55 = vsel %vm1284_vm3, %v2853_v46, %v2249_v56  ;;  %s2855_s22 = scalar_lea.vmem %s4557_s12, 4096  ;;  %p2862_p1 = scmp.lt.s32.totalorder %s4557_s12, %s2860_s26 }
 0x123   : > { %v1557_v59 = vpack.c.bf16 %v1535_v35, %v1534_v32  ;;  %v4172_v42 = vpop.permute.xlu0 %2546  ;;  %v1305_v49 = vsel %vm1284_vm3, %v2854_v33, %v2248_v44  ;;  %v1325_v41 = vsel %vm1317_vm4, %v1292_v51, %v2294_v31  ;;  %v1324_v47 = vsel %vm1317_vm4, %v1291_v26, %v2293_v48  ;;  %p2856_p12 = scmp.ne.s32.totalorder %s4557_s12, %s2855_s22  ;;  %p2863_p2 = scmp.lt.s32.totalorder %s2861_s29, %s2855_s22 }
 0x124   : > { %v1323_v43 = vsel %vm1317_vm4, %v1290_v22, %v2289_v37  ;;  %v2374_v28 = vunpack.i.h.bf16 %v3796_v38  ;;  %v2373_v25 = vunpack.i.l.bf16 %v3796_v38  ;;  %v1341_v29 = vsel %vm1317_vm4, %v1308_v11, %v2334_v36 }
 0x125   : > { %2109 = vmatmul.mubr.msk.bf16.vlgmr.msra.gmra.mrb[0].mxu1 %vm1586_vm11, %v1557_v59  ;;  %v4175_v60 = vpop.permute.xlu1 %2561  ;;  %v1340_v16 = vsel %vm1317_vm4, %v1307_v50, %v2333_v40  ;;  %v2369_v1 = vunpack.i.h.bf16 %v3798_v14  ;;  %v2413_v34 = vunpack.i.l.bf16 %v3853_v0  ;;  %v1338_v2 = vsel %vm1317_vm4, %v1305_v49, %v2328_v8  ;;  %p2857_p13 = pnand %p2856_p12, %p3012_p4  ;;  %p2864_p3 = por %p2863_p2, %p2862_p1 }
 0x126   : > { %v1339_v4 = vsel %vm1317_vm4, %v1306_v55, %v2329_v52  ;;  %v2409_v12 = vunpack.i.h.bf16 %v3855_v62  ;;  %v2408_v53 = vunpack.i.l.bf16 %v3855_v62  ;;  %v2414_v38 = vunpack.i.h.bf16 %v3853_v0 }
 0x127   : > { %v4181_v21 = vpop.permute.xlu0 %2556  ;;  %v2459_v32 = vunpack.i.h.bf16 %v3959_v39  ;;  %v2544_v35 = vunpack.i.h.bf16 %v4143_v10  ;;  %v2543_v59 = vunpack.i.l.bf16 %v4143_v10  ;;  %v1357_v14 = vsel %vm1350_vm5, %v1324_v47, %v2373_v25  ;;  %p2858_p0 = pneg %p2857_p13 }
 0x128   : > { %v1358_v24 = vsel %vm1350_vm5, %v1325_v41, %v2374_v28  ;;  %v2554_v3 = vunpack.i.h.bf16 %v4168_v45  ;;  %v2553_v17 = vunpack.i.l.bf16 %v4168_v45  ;;  %v1356_v62 = vsel %vm1350_vm5, %v1323_v43, %v2369_v1 }
 0x129   : > { %v4189_v15 = vpop.permute.xlu1 %2571  ;;  %v1373_v6 = vsel %vm1350_vm5, %v1340_v16, %v2413_v34  ;;  %v2549_v0 = vunpack.i.h.bf16 %v4172_v42  ;;  %v2548_v39 = vunpack.i.l.bf16 %v4172_v42  ;;  %v1371_v19 = vsel %vm1350_vm5, %v1338_v2, %v2408_v53  ;;  %p2865_p5 = pnand %p2864_p3, %p2858_p0 }
 0x12a   : > { %v1372_v10 = vsel %vm1350_vm5, %v1339_v4, %v2409_v12  ;;  %v2564_v27 = vunpack.i.h.bf16 %v4175_v60  ;;  %v2563_v30 = vunpack.i.l.bf16 %v4175_v60  ;;  %v1374_v45 = vsel %vm1350_vm5, %v1341_v29, %v2414_v38 }
 0x12b   : > { %v4203_v20 = vpop.permute.xlu0 %2566  ;;  %v1389_v44 = vsel %vm1383_vm6, %v1356_v62, %v2459_v32  ;;  %v1404_v18 = vsel %vm1383_vm6, %v1371_v19, %v2543_v59  ;;  %v1405_v31 = vsel %vm1383_vm6, %v1372_v10, %v2544_v35  ;;  %v1406_v42 = vsel %vm1383_vm6, %v1373_v6, %v2553_v17 }
 0x12c   : > { %v1407_v48 = vsel %vm1383_vm6, %v1374_v45, %v2554_v3  ;;  %v2559_v37 = vunpack.i.h.bf16 %v4181_v21  ;;  %v2558_v7 = vunpack.i.l.bf16 %v4181_v21  ;;  %v1391_v60 = vsel %vm1383_vm6, %v1358_v24, %v2549_v0 }
 0x12d   : > { %v4216_v5 = vpop.permute.xlu1 %2581  ;;  %v1390_v61 = vsel %vm1383_vm6, %v1357_v14, %v2548_v39  ;;  %v2574_v51 = vunpack.i.h.bf16 %v4189_v15  ;;  %v2573_v36 = vunpack.i.l.bf16 %v4189_v15  ;;  %v1437_v40 = vsel %vm1416_vm7, %v1404_v18, %v2563_v30 }
 0x12e   : > { %v1438_v57 = vsel %vm1416_vm7, %v1405_v31, %v2564_v27  ;;  %v2569_v26 = vunpack.i.h.bf16 %v4203_v20  ;;  %v2568_v13 = vunpack.i.l.bf16 %v4203_v20  ;;  %v2584_v21 = vunpack.i.h.bf16 %v4216_v5 }
 0x12f   : > { %v2577_v54 = vpop.permute.xlu0 %2576  ;;  %v2583_v52 = vunpack.i.l.bf16 %v4216_v5  ;;  %v1421_v50 = vsel %vm1416_vm7, %v3947_v9, %v2558_v7  ;;  %v1422_v15 = vsel %vm1416_vm7, %v1389_v44, %v2559_v37  ;;  %v1439_v49 = vsel %vm1416_vm7, %v1406_v42, %v2573_v36 }
 0x130   : > { %v2579_v8 = vunpack.i.h.bf16 %v2577_v54  ;;  %v2578_v58 = vunpack.i.l.bf16 %v2577_v54  ;;  %v1440_v41 = vsel %vm1416_vm7, %v1407_v48, %v2574_v51  ;;  %v1423_v43 = vsel %vm1416_vm7, %v1390_v61, %v2568_v13 }
 0x131   : > { %v2592_v63 = vpop.permute.xlu1 %2591  ;;  %v1424_v28 = vsel %vm1416_vm7, %v1391_v60, %v2569_v26  ;;  %v1470_v9 = vsel %vm1449_vm8, %v1437_v40, %v2583_v52  ;;  %v1471_v16 = vsel %vm1449_vm8, %v1438_v57, %v2584_v21 }
 0x132   : > { %v2594_v46 = vunpack.i.h.bf16 %v2592_v63  ;;  %v2593_v55 = vunpack.i.l.bf16 %v2592_v63  ;;  %v1454_v1 = vsel %vm1449_vm8, %v1421_v50, %v2578_v58  ;;  %v1455_v34 = vsel %vm1449_vm8, %v1422_v15, %v2579_v8 }
 0x133   : > { %v4242_v56 = vpop.permute.xlu0 %2586 }
 0x134   : > { %v2588_v20 = vunpack.i.l.bf16 %v4242_v56  ;;  %v1472_v2 = vsel %vm1449_vm8, %v1439_v49, %v2593_v55  ;;  %v1473_v4 = vsel %vm1449_vm8, %v1440_v41, %v2594_v46  ;;  %v2589_v12 = vunpack.i.h.bf16 %v4242_v56 }
 0x135   : > { %v2602_v22 = vpop.permute.xlu1 %2601 }
 0x136   : > { %v2603_v47 = vunpack.i.l.bf16 %v2602_v22  ;;  %v2604_v25 = vunpack.i.h.bf16 %v2602_v22  ;;  %v1456_v38 = vsel %vm1449_vm8, %v1423_v43, %v2588_v20  ;;  %v1457_v42 = vsel %vm1449_vm8, %v1424_v28, %v2589_v12  ;;  %v4734_v12 = vld [vmem:[#allocation24_spill] sm:$0xff] }
 0x137   : > { %v2597_v11 = vpop.permute.xlu0 %2596 }
 0x138   : > { %v2598_v5 = vunpack.i.l.bf16 %v2597_v11  ;;  %v2599_v53 = vunpack.i.h.bf16 %v2597_v11  ;;  %v1503_v32 = vsel %vm1482_vm9, %v1470_v9, %v2603_v47  ;;  %v1504_v14 = vsel %vm1482_vm9, %v1471_v16, %v2604_v25 }
 0x139   : > { %v2612_v33 = vpop.permute.xlu1 %2611 }
 0x13a   : > { %v1487_v24 = vsel %vm1482_vm9, %v1454_v1, %v2598_v5  ;;  %v2614_v3 = vunpack.i.h.bf16 %v2612_v33  ;;  %v2613_v17 = vunpack.i.l.bf16 %v2612_v33  ;;  %v1488_v19 = vsel %vm1482_vm9, %v1455_v34, %v2599_v53 }
 0x13b   : > { %v2607_v29 = vpop.permute.xlu0 %2606 }
 0x13c   : > { %v2609_v10 = vunpack.i.h.bf16 %v2607_v29  ;;  %v2608_v27 = vunpack.i.l.bf16 %v2607_v29  ;;  %v1505_v48 = vsel %vm1482_vm9, %v1472_v2, %v2613_v17  ;;  %v1506_v37 = vsel %vm1482_vm9, %v1473_v4, %v2614_v3 }
 0x13d   : > { %v2622_v54 = vpop.permute.xlu1 %2621 }
 0x13e   : > { %v2624_v35 = vunpack.i.h.bf16 %v2622_v54  ;;  %v2623_v59 = vunpack.i.l.bf16 %v2622_v54  ;;  %v1489_v40 = vsel %vm1482_vm9, %v1456_v38, %v2608_v27  ;;  %v1490_v57 = vsel %vm1482_vm9, %v1457_v42, %v2609_v10  ;;  %v4735_v54 = vld [vmem:[#allocation14_spill] sm:$0xff] }
 0x13f   : > { %v2617_v63 = vpop.permute.xlu0 %2616 }
 0x140   : > { %v1536_v62 = vsel %vm1515_vm10, %v1503_v32, %v2623_v59  ;;  %v1537_v6 = vsel %vm1515_vm10, %v1504_v14, %v2624_v35  ;;  %v2619_v0 = vunpack.i.h.bf16 %v2617_v63  ;;  %v2618_v39 = vunpack.i.l.bf16 %v2617_v63  ;;  %v4736_v32 = vld [vmem:[#allocation22_spill] sm:$0xff]  ;;  %v4737_v59 = vld [vmem:[#allocation23_spill] sm:$0xff] }
 0x141   : > { %v1558_v30 = vpack.c.bf16 %v1537_v6, %v1536_v62  ;;  %v2632_v56 = vpop.permute.xlu1 %2631  ;;  %v4739_v6 = vld [vmem:[#allocation5_spill] sm:$0xff] }
 0x142   : > { %v1520_v45 = vsel %vm1515_vm10, %v1487_v24, %v2618_v39  ;;  %v1521_v44 = vsel %vm1515_vm10, %v1488_v19, %v2619_v0  ;;  %v2634_v18 = vunpack.i.h.bf16 %v2632_v56  ;;  %v2633_v31 = vunpack.i.l.bf16 %v2632_v56  ;;  %v4738_v24 = vld [vmem:[#allocation11_spill] sm:$0xff] }
 0x143   : > { %v1550_v7 = vpack.c.bf16 %v1521_v44, %v1520_v45  ;;  %v2627_v22 = vpop.permute.xlu0 %2626  ;;  %2112 = vmatprep.mubr.msk.bf16.mxu1 %vm1586_vm11, %v1558_v30  ;;  %v4740_v0 = vld [vmem:[#allocation7_spill] sm:$0xff] }
 0x144   : > { %v1538_v60 = vsel %vm1515_vm10, %v1505_v48, %v2633_v31  ;;  %v1539_v61 = vsel %vm1515_vm10, %v1506_v37, %v2634_v18  ;;  %v2629_v51 = vunpack.i.h.bf16 %v2627_v22  ;;  %v2628_v36 = vunpack.i.l.bf16 %v2627_v22 }
 0x145   : > { %v1559_v26 = vpack.c.bf16 %v1539_v61, %v1538_v60  ;;  %2096 = vmatprep.mubr.msk.bf16.mxu0 %vm1586_vm11, %v1550_v7  ;;  %v2642_v13 = vpop.permute.xlu1 %2641 }
 0x146   : > { %v1522_v11 = vsel %vm1515_vm10, %v1489_v40, %v2628_v36  ;;  %v1523_v21 = vsel %vm1515_vm10, %v1490_v57, %v2629_v51  ;;  %v2644_v20 = vunpack.i.h.bf16 %v2642_v13  ;;  %v2643_v47 = vunpack.i.l.bf16 %v2642_v13 }
 0x147   : > { %v1551_v52 = vpack.c.bf16 %v1523_v21, %v1522_v11  ;;  %v2637_v8 = vpop.permute.xlu0 %2636  ;;  %2113 = vmatmul.mubr.msk.bf16.gmra.mrb[4].mxu1 %vm1586_vm11, %v1559_v26 }
 0x148   : > { %v2639_v43 = vunpack.i.h.bf16 %v2637_v8  ;;  %v2638_v28 = vunpack.i.l.bf16 %v2637_v8  ;;  %v1408_v4 = vsel %vm1383_vm6, %v3875_v23, %v2643_v47  ;;  %v1409_v53 = vsel %vm1383_vm6, %v4734_v12, %v2644_v20 }
 0x149   : > { %2097 = vmatmul.mubr.msk.bf16.gmra.mrb[4].mxu0 %vm1586_vm11, %v1551_v52  ;;  %v2652_v58 = vpop.permute.xlu1 %2651 }
 0x14a   : > { %v2654_v25 = vunpack.i.h.bf16 %v2652_v58  ;;  %v2653_v5 = vunpack.i.l.bf16 %v2652_v58  ;;  %v1392_v38 = vsel %vm1383_vm6, %v4735_v54, %v2638_v28  ;;  %v1393_v35 = vsel %vm1383_vm6, %v4736_v32, %v2639_v43 }
 0x14b   : > { %v2647_v50 = vpop.permute.xlu0 %2646 }
 0x14c   : > { %v2649_v9 = vunpack.i.h.bf16 %v2647_v50  ;;  %v2648_v16 = vunpack.i.l.bf16 %v2647_v50  ;;  %v1410_v14 = vsel %vm1383_vm6, %v4737_v59, %v2653_v5  ;;  %v1411_v3 = vsel %vm1383_vm6, %v4738_v24, %v2654_v25 }
 0x14d   : > { %v2662_v15 = vpop.permute.xlu1 %2661 }
 0x14e   : > { %v2664_v1 = vunpack.i.h.bf16 %v2662_v15  ;;  %v2663_v34 = vunpack.i.l.bf16 %v2662_v15  ;;  %v1395_v23 = vsel %vm1383_vm6, %v4739_v6, %v2649_v9  ;;  %v1394_v39 = vsel %vm1383_vm6, %v4740_v0, %v2648_v16 }
 0x14f   : > { %v2657_v46 = vpop.permute.xlu0 %2656 }
 0x150   : > { %v2659_v17 = vunpack.i.h.bf16 %v2657_v46  ;;  %v2658_v63 = vunpack.i.l.bf16 %v2657_v46  ;;  %v1441_v27 = vsel %vm1416_vm7, %v1408_v4, %v2663_v34  ;;  %v1442_v30 = vsel %vm1416_vm7, %v1409_v53, %v2664_v1 }
 0x151   : > { %v2672_v55 = vpop.permute.xlu1 %2671 }
 0x152   : > { %v2674_v19 = vunpack.i.h.bf16 %v2672_v55  ;;  %v2673_v10 = vunpack.i.l.bf16 %v2672_v55  ;;  %v1425_v37 = vsel %vm1416_vm7, %v1392_v38, %v2658_v63  ;;  %v1426_v7 = vsel %vm1416_vm7, %v1393_v35, %v2659_v17 }
 0x153   : > { %v2667_v33 = vpop.permute.xlu0 %2666 }
 0x154   : > { %v2669_v56 = vunpack.i.h.bf16 %v2667_v33  ;;  %v2668_v45 = vunpack.i.l.bf16 %v2667_v33  ;;  %v1443_v51 = vsel %vm1416_vm7, %v1410_v14, %v2673_v10  ;;  %v1444_v36 = vsel %vm1416_vm7, %v1411_v3, %v2674_v19 }
 0x155   : > { %v2682_v49 = vpop.permute.xlu1 %2681 }
 0x156   : > { %v2684_v18 = vunpack.i.h.bf16 %v2682_v49  ;;  %v2683_v31 = vunpack.i.l.bf16 %v2682_v49  ;;  %v1427_v26 = vsel %vm1416_vm7, %v1394_v39, %v2668_v45  ;;  %v1428_v13 = vsel %vm1416_vm7, %v1395_v23, %v2669_v56 }
 0x157   : > { %v2677_v41 = vpop.permute.xlu0 %2676 }
 0x158   : > { %v2679_v42 = vunpack.i.h.bf16 %v2677_v41  ;;  %v2678_v48 = vunpack.i.l.bf16 %v2677_v41  ;;  %v1474_v8 = vsel %vm1449_vm8, %v1441_v27, %v2683_v31  ;;  %v1475_v58 = vsel %vm1449_vm8, %v1442_v30, %v2684_v18 }
 0x159   : > { %v2692_v29 = vpop.permute.xlu1 %2691 }
 0x15a   : > { %v2694_v22 = vunpack.i.h.bf16 %v2692_v29  ;;  %v2693_v60 = vunpack.i.l.bf16 %v2692_v29  ;;  %v1458_v50 = vsel %vm1449_vm8, %v1425_v37, %v2678_v48  ;;  %v1459_v15 = vsel %vm1449_vm8, %v1426_v7, %v2679_v42 }
 0x15b   : > { %v4299_v2 = vpop.permute.xlu0 %2686 }
 0x15c   : > { %v2688_v40 = vunpack.i.l.bf16 %v4299_v2  ;;  %v1476_v46 = vsel %vm1449_vm8, %v1443_v51, %v2693_v60  ;;  %v1477_v55 = vsel %vm1449_vm8, %v1444_v36, %v2694_v22  ;;  %v2689_v33 = vunpack.i.h.bf16 %v4299_v2 }
 0x15d   : > { %v2702_v62 = vpop.permute.xlu1 %2701 }
 0x15e   : > { %v2703_v57 = vunpack.i.l.bf16 %v2702_v62  ;;  %v2704_v11 = vunpack.i.h.bf16 %v2702_v62  ;;  %v1460_v20 = vsel %vm1449_vm8, %v1427_v26, %v2688_v40  ;;  %v1461_v3 = vsel %vm1449_vm8, %v1428_v13, %v2689_v33  ;;  %v4742_v33 = vld [vmem:[#allocation12_spill] sm:$0xff] }
 0x15f   : > { %v2697_v44 = vpop.permute.xlu0 %2696 }
 0x160   : > { %v2698_v21 = vunpack.i.l.bf16 %v2697_v44  ;;  %v2699_v49 = vunpack.i.h.bf16 %v2697_v44  ;;  %v1507_v47 = vsel %vm1482_vm9, %v1474_v8, %v2703_v57  ;;  %v1508_v25 = vsel %vm1482_vm9, %v1475_v58, %v2704_v11 }
 0x161   : > { %v2712_v61 = vpop.permute.xlu1 %2711 }
 0x162   : > { %v1491_v5 = vsel %vm1482_vm9, %v1458_v50, %v2698_v21  ;;  %v2714_v29 = vunpack.i.h.bf16 %v2712_v61  ;;  %v2713_v9 = vunpack.i.l.bf16 %v2712_v61  ;;  %v1492_v12 = vsel %vm1482_vm9, %v1459_v15, %v2699_v49 }
 0x163   : > { %v2707_v52 = vpop.permute.xlu0 %2706 }
 0x164   : > { %v2709_v53 = vunpack.i.h.bf16 %v2707_v52  ;;  %v2708_v54 = vunpack.i.l.bf16 %v2707_v52  ;;  %v1509_v17 = vsel %vm1482_vm9, %v1476_v46, %v2713_v9  ;;  %v1510_v63 = vsel %vm1482_vm9, %v1477_v55, %v2714_v29  ;;  %v4741_v46 = vld [vmem:[#allocation25_spill] sm:$0xff] }
 0x165   : > { %v2722_v41 = vpop.permute.xlu1 %2721 }
 0x166   : > { %v2724_v43 = vunpack.i.h.bf16 %v2722_v41  ;;  %v2723_v28 = vunpack.i.l.bf16 %v2722_v41  ;;  %v1493_v10 = vsel %vm1482_vm9, %v1460_v20, %v2708_v54  ;;  %v1494_v27 = vsel %vm1482_vm9, %v1461_v3, %v2709_v53  ;;  %v4743_v41 = vld [vmem:[#allocation13_spill] sm:$0xff] }
 0x167   : > { %v2717_v16 = vpop.permute.xlu0 %2716 }
 0x168   : > { %v1540_v1 = vsel %vm1515_vm10, %v1507_v47, %v2723_v28  ;;  %v1541_v34 = vsel %vm1515_vm10, %v1508_v25, %v2724_v43  ;;  %v2719_v2 = vunpack.i.h.bf16 %v2717_v16  ;;  %v2718_v4 = vunpack.i.l.bf16 %v2717_v16  ;;  %v4744_v47 = vld [vmem:[#allocation8_spill] sm:$0xff]  ;;  %v4745_v28 = vld [vmem:[#allocation10_spill] sm:$0xff] }
 0x169   : > { %v1560_v38 = vpack.c.bf16 %v1541_v34, %v1540_v1  ;;  %v2732_v32 = vpop.permute.xlu1 %2731  ;;  %v4747_v34 = vld [vmem:[#allocation6_spill] sm:$0xff] }
 0x16a   : > { %v1524_v35 = vsel %vm1515_vm10, %v1491_v5, %v2718_v4  ;;  %v1525_v59 = vsel %vm1515_vm10, %v1492_v12, %v2719_v2  ;;  %v2734_v14 = vunpack.i.h.bf16 %v2732_v32  ;;  %v2733_v24 = vunpack.i.l.bf16 %v2732_v32  ;;  %v4746_v5 = vld [vmem:[#allocation15_spill] sm:$0xff]  ;;  %v4748_v4 = vld [vmem:[#allocation9_spill] sm:$0xff] }
 0x16b   : > { %v1552_v62 = vpack.c.bf16 %v1525_v59, %v1524_v35  ;;  %v2727_v6 = vpop.permute.xlu0 %2726  ;;  %2116 = vmatprep.mubr.msk.bf16.mxu1 %vm1586_vm11, %v1560_v38 }
 0x16c   : > { %v1542_v23 = vsel %vm1515_vm10, %v1509_v17, %v2733_v24  ;;  %v1543_v0 = vsel %vm1515_vm10, %v1510_v63, %v2734_v14  ;;  %v2729_v39 = vunpack.i.h.bf16 %v2727_v6  ;;  %v2728_v19 = vunpack.i.l.bf16 %v2727_v6 }
 0x16d   : > { %v1561_v30 = vpack.c.bf16 %v1543_v0, %v1542_v23  ;;  %2100 = vmatprep.mubr.msk.bf16.mxu0 %vm1586_vm11, %v1552_v62  ;;  %v2742_v56 = vpop.permute.xlu1 %2741 }
 0x16e   : > { %v1526_v45 = vsel %vm1515_vm10, %v1493_v10, %v2728_v19  ;;  %v1527_v44 = vsel %vm1515_vm10, %v1494_v27, %v2729_v39  ;;  %v2744_v36 = vunpack.i.h.bf16 %v2742_v56  ;;  %v2743_v40 = vunpack.i.l.bf16 %v2742_v56 }
 0x16f   : > { %v1553_v18 = vpack.c.bf16 %v1527_v44, %v1526_v45  ;;  %v2737_v31 = vpop.permute.xlu0 %2736  ;;  %2117 = vmatmul.mubr.msk.bf16.gmra.mrb[8].mxu1 %vm1586_vm11, %v1561_v30 }
 0x170   : > { %v2739_v57 = vunpack.i.h.bf16 %v2737_v31  ;;  %v2738_v26 = vunpack.i.l.bf16 %v2737_v31  ;;  %v1412_v55 = vsel %vm1383_vm6, %v4741_v46, %v2743_v40  ;;  %v1413_v49 = vsel %vm1383_vm6, %v4742_v33, %v2744_v36 }
 0x171   : > { %2101 = vmatmul.mubr.msk.bf16.gmra.mrb[8].mxu0 %vm1586_vm11, %v1553_v18  ;;  %v2752_v42 = vpop.permute.xlu1 %2751 }
 0x172   : > { %v2754_v13 = vunpack.i.h.bf16 %v2752_v42  ;;  %v2753_v11 = vunpack.i.l.bf16 %v2752_v42  ;;  %v1396_v20 = vsel %vm1383_vm6, %v4743_v41, %v2738_v26  ;;  %v1397_v43 = vsel %vm1383_vm6, %v4744_v47, %v2739_v57 }
 0x173   : > { %v2747_v48 = vpop.permute.xlu0 %2746 }
 0x174   : > { %v2749_v52 = vunpack.i.h.bf16 %v2747_v48  ;;  %v2748_v8 = vunpack.i.l.bf16 %v2747_v48  ;;  %v1414_v25 = vsel %vm1383_vm6, %v4745_v28, %v2753_v11  ;;  %v1415_v29 = vsel %vm1383_vm6, %v4746_v5, %v2754_v13 }
 0x175   : > { %v2762_v37 = vpop.permute.xlu1 %2761 }
 0x176   : > { %v2764_v58 = vunpack.i.h.bf16 %v2762_v37  ;;  %v2763_v50 = vunpack.i.l.bf16 %v2762_v37  ;;  %v1399_v2 = vsel %vm1383_vm6, %v4747_v34, %v2749_v52  ;;  %v1398_v12 = vsel %vm1383_vm6, %v4748_v4, %v2748_v8 }
 0x177   : > { %v2757_v7 = vpop.permute.xlu0 %2756 }
 0x178   : > { %v2759_v9 = vunpack.i.h.bf16 %v2757_v7  ;;  %v2758_v16 = vunpack.i.l.bf16 %v2757_v7  ;;  %v1445_v38 = vsel %vm1416_vm7, %v1412_v55, %v2763_v50  ;;  %v1446_v32 = vsel %vm1416_vm7, %v1413_v49, %v2764_v58 }
 0x179   : > { %v2772_v22 = vpop.permute.xlu1 %2771 }
 0x17a   : > { %v2774_v53 = vunpack.i.h.bf16 %v2772_v22  ;;  %v2773_v54 = vunpack.i.l.bf16 %v2772_v22  ;;  %v1429_v62 = vsel %vm1416_vm7, %v1396_v20, %v2758_v16  ;;  %v1430_v6 = vsel %vm1416_vm7, %v1397_v43, %v2759_v9 }
 0x17b   : > { %v2767_v60 = vpop.permute.xlu0 %2766 }
 0x17c   : > { %v2769_v35 = vunpack.i.h.bf16 %v2767_v60  ;;  %v2768_v59 = vunpack.i.l.bf16 %v2767_v60  ;;  %v1447_v19 = vsel %vm1416_vm7, %v1414_v25, %v2773_v54  ;;  %v1448_v10 = vsel %vm1416_vm7, %v1415_v29, %v2774_v53 }
 0x17d   : > { %v2782_v61 = vpop.permute.xlu1 %2781 }
 0x17e   : > { %v2784_v24 = vunpack.i.h.bf16 %v2782_v61  ;;  %v2783_v3 = vunpack.i.l.bf16 %v2782_v61  ;;  %v1431_v56 = vsel %vm1416_vm7, %v1398_v12, %v2768_v59  ;;  %v1432_v45 = vsel %vm1416_vm7, %v1399_v2, %v2769_v35 }
 0x17f   : > { %v2777_v51 = vpop.permute.xlu0 %2776 }
 0x180   : > { %v2779_v17 = vunpack.i.h.bf16 %v2777_v51  ;;  %v2778_v63 = vunpack.i.l.bf16 %v2777_v51  ;;  %v1478_v42 = vsel %vm1449_vm8, %v1445_v38, %v2783_v3  ;;  %v1479_v48 = vsel %vm1449_vm8, %v1446_v32, %v2784_v24  ;;  %v4415_v24 = vld [vmem:[%s4613_s2] ss:$0 sm:$0xff] }
 0x181   : > { %v2792_v21 = vpop.permute.xlu1 %2791 }
 0x182   : > { %v2794_v23 = vunpack.i.h.bf16 %v2792_v21  ;;  %v2793_v0 = vunpack.i.l.bf16 %v2792_v21  ;;  %v1462_v37 = vsel %vm1449_vm8, %v1429_v62, %v2778_v63  ;;  %v1463_v7 = vsel %vm1449_vm8, %v1430_v6, %v2779_v17  ;;  %v4422_v17 = vld [vmem:[%s4614_s3] ss:$0 sm:$0xff] }
 0x183   : > { %v4355_v15 = vpop.permute.xlu0 %2786 }
 0x184   : > { %v2788_v27 = vunpack.i.l.bf16 %v4355_v15  ;;  %v1480_v22 = vsel %vm1449_vm8, %v1447_v19, %v2793_v0  ;;  %v1481_v60 = vsel %vm1449_vm8, %v1448_v10, %v2794_v23  ;;  %v2789_v61 = vunpack.i.h.bf16 %v4355_v15 }
 0x185   : > { %v2802_v1 = vpop.permute.xlu1 %2801 }
 0x186   : > { %v2803_v30 = vunpack.i.l.bf16 %v2802_v1  ;;  %v2804_v44 = vunpack.i.h.bf16 %v2802_v1  ;;  %v1464_v40 = vsel %vm1449_vm8, %v1431_v56, %v2788_v27  ;;  %v1465_v29 = vsel %vm1449_vm8, %v1432_v45, %v2789_v61 }
 0x187   : > { %v2797_v14 = vpop.permute.xlu0 %2796 }
 0x188   : > { %v2798_v18 = vunpack.i.l.bf16 %v2797_v14  ;;  %v2799_v51 = vunpack.i.h.bf16 %v2797_v14  ;;  %v1511_v57 = vsel %vm1482_vm9, %v1478_v42, %v2803_v30  ;;  %v1512_v11 = vsel %vm1482_vm9, %v1479_v48, %v2804_v44 }
 0x189   : > { %v2812_v39 = vpop.permute.xlu1 %2811 }
 0x18a   : > { %v1495_v21 = vsel %vm1482_vm9, %v1462_v37, %v2798_v18  ;;  %v2814_v52 = vunpack.i.h.bf16 %v2812_v39  ;;  %v2813_v8 = vunpack.i.l.bf16 %v2812_v39  ;;  %v1496_v33 = vsel %vm1482_vm9, %v1463_v7, %v2799_v51 }
 0x18b   : > { %v2807_v31 = vpop.permute.xlu0 %2806 }
 0x18c   : > { %v2809_v49 = vunpack.i.h.bf16 %v2807_v31  ;;  %v2808_v41 = vunpack.i.l.bf16 %v2807_v31  ;;  %v1513_v9 = vsel %vm1482_vm9, %v1480_v22, %v2813_v8  ;;  %v1514_v16 = vsel %vm1482_vm9, %v1481_v60, %v2814_v52 }
 0x18d   : > { %v2822_v36 = vpop.permute.xlu1 %2821 }
 0x18e   : > { %v2824_v26 = vunpack.i.h.bf16 %v2822_v36  ;;  %v2823_v13 = vunpack.i.l.bf16 %v2822_v36  ;;  %v1497_v54 = vsel %vm1482_vm9, %v1464_v40, %v2808_v41  ;;  %v1498_v38 = vsel %vm1482_vm9, %v1465_v29, %v2809_v49 }
 0x18f   : > { %v2817_v58 = vpop.permute.xlu0 %2816 }
 0x190   : > { %v1544_v50 = vsel %vm1515_vm10, %v1511_v57, %v2823_v13  ;;  %v1545_v46 = vsel %vm1515_vm10, %v1512_v11, %v2824_v26  ;;  %v2819_v15 = vunpack.i.h.bf16 %v2817_v58  ;;  %v2818_v55 = vunpack.i.l.bf16 %v2817_v58 }
 0x191   : > { %v1562_v20 = vpack.c.bf16 %v1545_v46, %v1544_v50  ;;  %v2832_v47 = vpop.permute.xlu1 %2831 }
 0x192   : > { %v1528_v43 = vsel %vm1515_vm10, %v1495_v21, %v2818_v55  ;;  %v1529_v28 = vsel %vm1515_vm10, %v1496_v33, %v2819_v15  ;;  %v2834_v25 = vunpack.i.h.bf16 %v2832_v47  ;;  %v2833_v5 = vunpack.i.l.bf16 %v2832_v47 }
 0x193   : > { %v1554_v1 = vpack.c.bf16 %v1529_v28, %v1528_v43  ;;  %v2827_v34 = vpop.permute.xlu0 %2826  ;;  %2120 = vmatprep.mubr.msk.bf16.mxu1 %vm1586_vm11, %v1562_v20 }
 0x194   : > { %v1546_v2 = vsel %vm1515_vm10, %v1513_v9, %v2833_v5  ;;  %v1547_v4 = vsel %vm1515_vm10, %v1514_v16, %v2834_v25  ;;  %v2829_v12 = vunpack.i.h.bf16 %v2827_v34  ;;  %v2828_v53 = vunpack.i.l.bf16 %v2827_v34 }
 0x195   : > { %v1563_v32 = vpack.c.bf16 %v1547_v4, %v1546_v2  ;;  %2104 = vmatprep.mubr.msk.bf16.mxu0 %vm1586_vm11, %v1554_v1 }
 0x196   : > { %v1530_v35 = vsel %vm1515_vm10, %v1497_v54, %v2828_v53  ;;  %v1531_v59 = vsel %vm1515_vm10, %v1498_v38, %v2829_v12 }
 0x197   : > { %v1555_v14 = vpack.c.bf16 %v1531_v59, %v1530_v35  ;;  %2121 = vmatmul.mubr.msk.bf16.gmra.mrb[12].mxu1 %vm1586_vm11, %v1563_v32 }
 0x199   : > { %2105 = vmatmul.mubr.msk.bf16.gmra.mrb[12].mxu0 %vm1586_vm11, %v1555_v14 }
 0x1f2   : > { %v2094_v3 = vpop.f32.mrb[0].mxu0 }
 0x1f3   : > { %v1684_v63 = vadd.f32 %v2094_v3, %v4415_v24  ;;  %v1675_v62 = vpop.f32.mrb[1].mxu0 }
 0x1f4   : > { %v1676_v6 = vadd.f32 %v4415_v24, %v1675_v62  ;;  %v2095_v23 = vpop.f32.mrb[2].mxu0 }
 0x1f5   : > { %vm1805_vm12 = vcmp.ge.f32.partialorder %v1684_v63, 0.0  ;;  %v1843_v0 = vmul.f32 %v4422_v17, %v1684_v63  ;;  %v1687_v39 = vadd.f32 %v2095_v23, %v4415_v24  ;;  %v1678_v19 = vpop.f32.mrb[3].mxu0 }
 0x1f6   : > { %vm1803_vm14 = vcmp.ge.f32.partialorder %v1676_v6, 0.0  ;;  %v1841_v10 = vmul.f32 %v4422_v17, %v1676_v6  ;;  %v1679_v27 = vadd.f32 %v4415_v24, %v1678_v19 }
 0x1f7   : > { %v1875_v30 = vsel %vm1805_vm12, %v1684_v63, %v1843_v0  ;;  %vm1806_vm15 = vcmp.ge.f32.partialorder %v1687_v39, 0.0  ;;  %v1844_v56 = vmul.f32 %v4422_v17, %v1687_v39 }
 0x1f8   : > { %1908 = vst.msk [vmem:[%s4431_s10 + $0x10] sm:$0xff] %vm1905_vm13, %v1875_v30  ;;  %v1873_v45 = vsel %vm1803_vm14, %v1676_v6, %v1841_v10  ;;  %vm1804_vm0 = vcmp.ge.f32.partialorder %v1679_v27, 0.0  ;;  %v1842_v44 = vmul.f32 %v4422_v17, %v1679_v27  ;;  %v2110_v18 = vpop.f32.mrb[0].mxu1 }
 0x1f9   : > { %1906 = vst.msk [vmem:[%s4431_s10] sm:$0xff] %vm1905_vm13, %v1873_v45  ;;  %v1876_v31 = vsel %vm1806_vm15, %v1687_v39, %v1844_v56  ;;  %v1748_v42 = vadd.f32 %v2110_v18, %v4415_v24  ;;  %v1739_v48 = vpop.f32.mrb[1].mxu1 }
 0x1fa   : > { %1909 = vst.msk [vmem:[%s4431_s10 + $0x18] sm:$0xff] %vm1905_vm13, %v1876_v31  ;;  %v1874_v37 = vsel %vm1804_vm0, %v1679_v27, %v1842_v44  ;;  %v1740_v7 = vadd.f32 %v4415_v24, %v1739_v48  ;;  %v2111_v22 = vpop.f32.mrb[2].mxu1 }
 0x1fb   : > { %1907 = vst.msk [vmem:[%s4431_s10 + $0x8] sm:$0xff] %vm1905_vm13, %v1874_v37  ;;  %vm1821_vm1 = vcmp.ge.f32.partialorder %v1748_v42, 0.0  ;;  %v1859_v60 = vmul.f32 %v4422_v17, %v1748_v42  ;;  %v1751_v61 = vadd.f32 %v2111_v22, %v4415_v24  ;;  %v1742_v51 = vpop.f32.mrb[3].mxu1 }
 0x1fc   : > { %vm1819_vm2 = vcmp.ge.f32.partialorder %v1740_v7, 0.0  ;;  %v1857_v36 = vmul.f32 %v4422_v17, %v1740_v7  ;;  %v1743_v40 = vadd.f32 %v4415_v24, %v1742_v51 }
 0x1fd   : > { %v1891_v57 = vsel %vm1821_vm1, %v1748_v42, %v1859_v60  ;;  %vm1822_vm3 = vcmp.ge.f32.partialorder %v1751_v61, 0.0  ;;  %v1860_v26 = vmul.f32 %v4422_v17, %v1751_v61 }
 0x1fe   : > { %1924 = vst.msk [vmem:[%s4431_s10 + $0x90] sm:$0xff] %vm1905_vm13, %v1891_v57  ;;  %v1889_v13 = vsel %vm1819_vm2, %v1740_v7, %v1857_v36  ;;  %vm1820_vm4 = vcmp.ge.f32.partialorder %v1743_v40, 0.0  ;;  %v1858_v11 = vmul.f32 %v4422_v17, %v1743_v40 }
 0x1ff   : > { %1922 = vst.msk [vmem:[%s4431_s10 + $0x80] sm:$0xff] %vm1905_vm13, %v1889_v13  ;;  %v1892_v21 = vsel %vm1822_vm3, %v1751_v61, %v1860_v26 }
 0x200   : > { %1925 = vst.msk [vmem:[%s4431_s10 + $0x98] sm:$0xff] %vm1905_vm13, %v1892_v21  ;;  %v1890_v52 = vsel %vm1820_vm4, %v1743_v40, %v1858_v11 }
 0x201   : > { %1923 = vst.msk [vmem:[%s4431_s10 + $0x88] sm:$0xff] %vm1905_vm13, %v1890_v52 }
 0x21a   : > { %v2114_v8 = vpop.f32.mrb[4].mxu1 }
 0x21b   : > { %v1764_v58 = vadd.f32 %v2114_v8, %v4415_v24  ;;  %v1755_v50 = vpop.f32.mrb[5].mxu1 }
 0x21c   : > { %v2098_v46 = vpop.f32.mrb[4].mxu0  ;;  %v1756_v15 = vadd.f32 %v4415_v24, %v1755_v50  ;;  %v2115_v55 = vpop.f32.mrb[6].mxu1 }
 0x21d   : > { %v1700_v33 = vadd.f32 %v2098_v46, %v4415_v24  ;;  %vm1825_vm5 = vcmp.ge.f32.partialorder %v1764_v58, 0.0  ;;  %v1863_v49 = vmul.f32 %v4422_v17, %v1764_v58  ;;  %v1691_v41 = vpop.f32.mrb[5].mxu0  ;;  %v1767_v20 = vadd.f32 %v2115_v55, %v4415_v24  ;;  %v1758_v47 = vpop.f32.mrb[7].mxu1 }
 0x21e   : > { %v1692_v43 = vadd.f32 %v4415_v24, %v1691_v41  ;;  %vm1823_vm6 = vcmp.ge.f32.partialorder %v1756_v15, 0.0  ;;  %v1861_v28 = vmul.f32 %v4422_v17, %v1756_v15  ;;  %v2099_v25 = vpop.f32.mrb[6].mxu0  ;;  %v1759_v5 = vadd.f32 %v4415_v24, %v1758_v47 }
 0x21f   : > { %vm1809_vm7 = vcmp.ge.f32.partialorder %v1700_v33, 0.0  ;;  %v1847_v29 = vmul.f32 %v4422_v17, %v1700_v33  ;;  %v1895_v9 = vsel %vm1825_vm5, %v1764_v58, %v1863_v49  ;;  %v1703_v16 = vadd.f32 %v2099_v25, %v4415_v24  ;;  %v1694_v1 = vpop.f32.mrb[7].mxu0 }
 0x220   : > { %1928 = vst.msk [vmem:[%s4431_s10 + $0xb0] sm:$0xff] %vm1905_vm13, %v1895_v9  ;;  %vm1807_vm8 = vcmp.ge.f32.partialorder %v1692_v43, 0.0  ;;  %v1845_v34 = vmul.f32 %v4422_v17, %v1692_v43  ;;  %v1893_v2 = vsel %vm1823_vm6, %v1756_v15, %v1861_v28  ;;  %vm1826_vm9 = vcmp.ge.f32.partialorder %v1767_v20, 0.0 }
 0x221   : > { %v1879_v4 = vsel %vm1809_vm7, %v1700_v33, %v1847_v29  ;;  %1926 = vst.msk [vmem:[%s4431_s10 + $0xa0] sm:$0xff] %vm1905_vm13, %v1893_v2  ;;  %vm1810_vm10 = vcmp.ge.f32.partialorder %v1703_v16, 0.0  ;;  %v1848_v12 = vmul.f32 %v4422_v17, %v1703_v16  ;;  %v1864_v53 = vmul.f32 %v4422_v17, %v1767_v20 }
 0x222   : > { %1912 = vst.msk [vmem:[%s4431_s10 + $0x30] sm:$0xff] %vm1905_vm13, %v1879_v4  ;;  %v1877_v54 = vsel %vm1807_vm8, %v1692_v43, %v1845_v34  ;;  %v1695_v38 = vadd.f32 %v4415_v24, %v1694_v1  ;;  %vm1824_vm11 = vcmp.ge.f32.partialorder %v1759_v5, 0.0  ;;  %v1862_v32 = vmul.f32 %v4422_v17, %v1759_v5 }
 0x223   : > { %1910 = vst.msk [vmem:[%s4431_s10 + $0x20] sm:$0xff] %vm1905_vm13, %v1877_v54  ;;  %v1880_v35 = vsel %vm1810_vm10, %v1703_v16, %v1848_v12  ;;  %v1896_v59 = vsel %vm1826_vm9, %v1767_v20, %v1864_v53 }
 0x224   : > { %1913 = vst.msk [vmem:[%s4431_s10 + $0x38] sm:$0xff] %vm1905_vm13, %v1880_v35  ;;  %1929 = vst.msk [vmem:[%s4431_s10 + $0xb8] sm:$0xff] %vm1905_vm13, %v1896_v59  ;;  %vm1808_vm12 = vcmp.ge.f32.partialorder %v1695_v38, 0.0  ;;  %v1846_v14 = vmul.f32 %v4422_v17, %v1695_v38  ;;  %v1894_v3 = vsel %vm1824_vm11, %v1759_v5, %v1862_v32 }
 0x225   : > { %1927 = vst.msk [vmem:[%s4431_s10 + $0xa8] sm:$0xff] %vm1905_vm13, %v1894_v3 }
 0x226   : > { %v1878_v63 = vsel %vm1808_vm12, %v1695_v38, %v1846_v14 }
 0x227   : > { %1911 = vst.msk [vmem:[%s4431_s10 + $0x28] sm:$0xff] %vm1905_vm13, %v1878_v63 }
 0x242   : > { %v2118_v62 = vpop.f32.mrb[8].mxu1 }
 0x243   : > { %v1780_v6 = vadd.f32 %v2118_v62, %v4415_v24  ;;  %v1771_v23 = vpop.f32.mrb[9].mxu1 }
 0x244   : > { %v2102_v0 = vpop.f32.mrb[8].mxu0  ;;  %v1772_v39 = vadd.f32 %v4415_v24, %v1771_v23  ;;  %v2119_v19 = vpop.f32.mrb[10].mxu1 }
 0x245   : > { %v1716_v10 = vadd.f32 %v2102_v0, %v4415_v24  ;;  %vm1829_vm14 = vcmp.ge.f32.partialorder %v1780_v6, 0.0  ;;  %v1867_v27 = vmul.f32 %v4422_v17, %v1780_v6  ;;  %v1707_v30 = vpop.f32.mrb[9].mxu0  ;;  %v1783_v56 = vadd.f32 %v2119_v19, %v4415_v24  ;;  %v1774_v45 = vpop.f32.mrb[11].mxu1 }
 0x246   : > { %v1708_v44 = vadd.f32 %v4415_v24, %v1707_v30  ;;  %vm1827_vm15 = vcmp.ge.f32.partialorder %v1772_v39, 0.0  ;;  %v1865_v18 = vmul.f32 %v4422_v17, %v1772_v39  ;;  %v2103_v31 = vpop.f32.mrb[10].mxu0  ;;  %v1775_v42 = vadd.f32 %v4415_v24, %v1774_v45 }
 0x247   : > { %vm1813_vm0 = vcmp.ge.f32.partialorder %v1716_v10, 0.0  ;;  %v1851_v48 = vmul.f32 %v4422_v17, %v1716_v10  ;;  %v1899_v37 = vsel %vm1829_vm14, %v1780_v6, %v1867_v27  ;;  %v1719_v7 = vadd.f32 %v2103_v31, %v4415_v24  ;;  %v1710_v22 = vpop.f32.mrb[11].mxu0 }
 0x248   : > { %1932 = vst.msk [vmem:[%s4431_s10 + $0xd0] sm:$0xff] %vm1905_vm13, %v1899_v37  ;;  %vm1811_vm1 = vcmp.ge.f32.partialorder %v1708_v44, 0.0  ;;  %v1849_v60 = vmul.f32 %v4422_v17, %v1708_v44  ;;  %v1897_v61 = vsel %vm1827_vm15, %v1772_v39, %v1865_v18  ;;  %vm1830_vm2 = vcmp.ge.f32.partialorder %v1783_v56, 0.0 }
 0x249   : > { %v1883_v51 = vsel %vm1813_vm0, %v1716_v10, %v1851_v48  ;;  %1930 = vst.msk [vmem:[%s4431_s10 + $0xc0] sm:$0xff] %vm1905_vm13, %v1897_v61  ;;  %vm1814_vm3 = vcmp.ge.f32.partialorder %v1719_v7, 0.0  ;;  %v1852_v36 = vmul.f32 %v4422_v17, %v1719_v7  ;;  %v1868_v40 = vmul.f32 %v4422_v17, %v1783_v56 }
 0x24a   : > { %1916 = vst.msk [vmem:[%s4431_s10 + $0x50] sm:$0xff] %vm1905_vm13, %v1883_v51  ;;  %v1881_v57 = vsel %vm1811_vm1, %v1708_v44, %v1849_v60  ;;  %v1711_v26 = vadd.f32 %v4415_v24, %v1710_v22  ;;  %vm1828_vm4 = vcmp.ge.f32.partialorder %v1775_v42, 0.0  ;;  %v1866_v13 = vmul.f32 %v4422_v17, %v1775_v42 }
 0x24b   : > { %1914 = vst.msk [vmem:[%s4431_s10 + $0x40] sm:$0xff] %vm1905_vm13, %v1881_v57  ;;  %v1884_v11 = vsel %vm1814_vm3, %v1719_v7, %v1852_v36  ;;  %v1900_v21 = vsel %vm1830_vm2, %v1783_v56, %v1868_v40 }
 0x24c   : > { %1917 = vst.msk [vmem:[%s4431_s10 + $0x58] sm:$0xff] %vm1905_vm13, %v1884_v11  ;;  %1933 = vst.msk [vmem:[%s4431_s10 + $0xd8] sm:$0xff] %vm1905_vm13, %v1900_v21  ;;  %vm1812_vm5 = vcmp.ge.f32.partialorder %v1711_v26, 0.0  ;;  %v1850_v52 = vmul.f32 %v4422_v17, %v1711_v26  ;;  %v1898_v8 = vsel %vm1828_vm4, %v1775_v42, %v1866_v13 }
 0x24d   : > { %1931 = vst.msk [vmem:[%s4431_s10 + $0xc8] sm:$0xff] %vm1905_vm13, %v1898_v8 }
 0x24e   : > { %v1882_v58 = vsel %vm1812_vm5, %v1711_v26, %v1850_v52 }
 0x24f   : > { %1915 = vst.msk [vmem:[%s4431_s10 + $0x48] sm:$0xff] %vm1905_vm13, %v1882_v58 }
 0x26a   : > { %v2122_v50 = vpop.f32.mrb[12].mxu1 }
 0x26b   : > { %v1796_v46 = vadd.f32 %v2122_v50, %v4415_v24  ;;  %v1787_v15 = vpop.f32.mrb[13].mxu1 }
 0x26c   : > { %v2106_v55 = vpop.f32.mrb[12].mxu0  ;;  %v1788_v33 = vadd.f32 %v4415_v24, %v1787_v15  ;;  %v2123_v49 = vpop.f32.mrb[14].mxu1 }
 0x26d   : > { %v1732_v41 = vadd.f32 %v2106_v55, %v4415_v24  ;;  %vm1833_vm6 = vcmp.ge.f32.partialorder %v1796_v46, 0.0  ;;  %v1871_v20 = vmul.f32 %v4422_v17, %v1796_v46  ;;  %v1723_v47 = vpop.f32.mrb[13].mxu0  ;;  %v1799_v43 = vadd.f32 %v2123_v49, %v4415_v24  ;;  %v1790_v28 = vpop.f32.mrb[15].mxu1 }
 0x26e   : > { %v1724_v25 = vadd.f32 %v4415_v24, %v1723_v47  ;;  %vm1831_vm7 = vcmp.ge.f32.partialorder %v1788_v33, 0.0  ;;  %v1869_v5 = vmul.f32 %v4422_v17, %v1788_v33  ;;  %v2107_v29 = vpop.f32.mrb[14].mxu0  ;;  %v1791_v9 = vadd.f32 %v4415_v24, %v1790_v28 }
 0x26f   : > { %vm1817_vm8 = vcmp.ge.f32.partialorder %v1732_v41, 0.0  ;;  %v1855_v16 = vmul.f32 %v4422_v17, %v1732_v41  ;;  %v1903_v1 = vsel %vm1833_vm6, %v1796_v46, %v1871_v20  ;;  %v1735_v34 = vadd.f32 %v2107_v29, %v4415_v24  ;;  %v1726_v2 = vpop.f32.mrb[15].mxu0 }
 0x270   : > { %1936 = vst.msk [vmem:[%s4431_s10 + $0xf0] sm:$0xff] %vm1905_vm13, %v1903_v1  ;;  %vm1815_vm9 = vcmp.ge.f32.partialorder %v1724_v25, 0.0  ;;  %v1853_v4 = vmul.f32 %v4422_v17, %v1724_v25  ;;  %v1901_v12 = vsel %vm1831_vm7, %v1788_v33, %v1869_v5  ;;  %vm1834_vm10 = vcmp.ge.f32.partialorder %v1799_v43, 0.0 }
 0x271   : > { %v1887_v53 = vsel %vm1817_vm8, %v1732_v41, %v1855_v16  ;;  %1934 = vst.msk [vmem:[%s4431_s10 + $0xe0] sm:$0xff] %vm1905_vm13, %v1901_v12  ;;  %vm1818_vm11 = vcmp.ge.f32.partialorder %v1735_v34, 0.0  ;;  %v1856_v54 = vmul.f32 %v4422_v17, %v1735_v34  ;;  %v1872_v38 = vmul.f32 %v4422_v17, %v1799_v43 }
 0x272   : > { %1920 = vst.msk [vmem:[%s4431_s10 + $0x70] sm:$0xff] %vm1905_vm13, %v1887_v53  ;;  %v1885_v32 = vsel %vm1815_vm9, %v1724_v25, %v1853_v4  ;;  %v1727_v35 = vadd.f32 %v4415_v24, %v1726_v2  ;;  %vm1832_vm12 = vcmp.ge.f32.partialorder %v1791_v9, 0.0  ;;  %v1870_v59 = vmul.f32 %v4422_v17, %v1791_v9 }
 0x273   : > { %1918 = vst.msk [vmem:[%s4431_s10 + $0x60] sm:$0xff] %vm1905_vm13, %v1885_v32  ;;  %v1888_v14 = vsel %vm1818_vm11, %v1735_v34, %v1856_v54  ;;  %v1904_v3 = vsel %vm1834_vm10, %v1799_v43, %v1872_v38 }
 0x274   : > { %1921 = vst.msk [vmem:[%s4431_s10 + $0x78] sm:$0xff] %vm1905_vm13, %v1888_v14  ;;  %1937 = vst.msk [vmem:[%s4431_s10 + $0xf8] sm:$0xff] %vm1905_vm13, %v1904_v3  ;;  %vm1816_vm14 = vcmp.ge.f32.partialorder %v1727_v35, 0.0  ;;  %v1854_v63 = vmul.f32 %v4422_v17, %v1727_v35  ;;  %v1902_v62 = vsel %vm1832_vm12, %v1791_v9, %v1870_v59 }
 0x275   : > { %1935 = vst.msk [vmem:[%s4431_s10 + $0xe8] sm:$0xff] %vm1905_vm13, %v1902_v62 }
 0x276   : > { %v1886_v24 = vsel %vm1816_vm14, %v1727_v35, %v1854_v63 }
 0x277   : > { %1919 = vst.msk [vmem:[%s4431_s10 + $0x68] sm:$0xff] %vm1905_vm13, %v1886_v24 }
 0x278   : > { %2868 = shalt.err (!%p2865_p5)
}
 0x279   : > { %s2869_s30 = scalar_lea.hbm %s4555_s14, 4096  ;;  %s2873_s7 = scalar_lea.hbm %s4615_s4, 8192 }
 0x27a   : > { %p2870_p6 = scmp.ne.s32.totalorder %s4555_s14, %s2869_s30  ;;  %p2874_p10 = scmp.lt.u32.totalorder %s4555_s14, %s4615_s4 }
 0x27b   : > { %p2875_p11 = scmp.lt.u32.totalorder %s2873_s7, %s2869_s30  ;;  %p2877_p13 = scmp.lt.u32.totalorder %s2869_s30, %s4555_s14 }
 0x27c   : > { %p2871_p7 = pnand %p2870_p6, %p3012_p4 }
 0x27d   : > { %p2876_p12 = por %p2875_p11, %p2874_p10 }
 0x27e   : > { %p2872_p9 = pneg %p2871_p7 }
 0x27f   : > { %p2878_p0 = por %p2877_p13, %p2876_p12 }
 0x281   : > { %p2879_p1 = pnand %p2878_p0, %p2872_p9 }
 0x283   : > { %2882 = shalt.err (!%p2879_p1)
}
 0x284   : > { %s2945_s10 = smov 128   ;;  %s2946_s11 = smov 8  }
 0x285   : > { %2129 = dma.vmem_to_hbm [thread:$0]  (%p3012_p4), %s4557_s12, 4096, %s4555_s14, %s4565_s21, %s2945_s10, %s2945_s10, %s2946_s11  }
 0x286 PF: > { %p2135_p2 = scmp.ge.s32.totalorder %s2933_s20, 2  ;;  %s1970_s18 = sand.u32 1, %s2913_s15  }
 0x287   : > { %s1971_s13 = scalar_lea.sflag [#allocation3], %s1970_s18 }
 0x288   : > { %p2132_p3 = pnand %p2135_p2, %p3019_p8 }
 0x28a   : > { %2908 = dma.done.wait (!%p2132_p3), %s1971_s13, 4096  }
 0x28b   : > { %2910 = vsyncadd (!%p2132_p3), %s1971_s13, 4294963200  ;;  %s17_s20 = sadd.s32 1, %s2933_s20   ;;  %s4749_s15 = smov %s2917_s16 }
 0x28c   : > { %p14_p5 = scmp.ge.s32.totalorder %s17_s20, 4   ;;  %s4750_s16 = smov %s2921_s17 }
 0x28d   : > { %s4751_s17 = smov %s3025_s28  ;;  %s4752_s18 = smov %s2929_s19 }
 0x28e   : > { %s4753_s19 = smov %s4755_s23  ;;  %16 = sbr.rel (!%p14_p5) target bundleno = 4 (0x4), region = 71 }
 0x295   :  { %1976 = vsyncpa [#allocation3], 1 }
 0x296   :  { %1978 = vsyncpa [#allocation3 + $0x1], 1 }

</bundles_post_ra>
